<compile_context>
chip_gen: v7x
topology: tpu7x:2x2x1
jax: 0.10.0
libtpu: 0.0.40
codegen_flags: <defaults>
</compile_context>

<pallas_src>
import functools

import jax
import jax.numpy as jnp
import numpy as np
from jax.experimental import pallas as pl
from jax.experimental.pallas import tpu as pltpu

BN_EPS = 1e-5
# MXU-native operand dtype for the conv contraction; set to jnp.float32 for a
# bit-accurate conv (elementwise/BN math is always f32).
MATMUL_DTYPE = jnp.bfloat16

# tap t = (dy+1)*3 + (dx+1) == ky*3 + kx  (matches the weight packing below)
_TAP_OFFSETS = tuple((dy, dx) for dy in (-1, 0, 1) for dx in (-1, 0, 1))


def _fused_encoder_kernel(masks_ref, x_ref, w_ref, gamma_ref, beta_ref, sel_ref,
                          o_ref, pm_ref, *, layer_count, W, P):
    # masks_ref : (9, P)       tap-validity masks (0/1 f32), lane-dense
    # x_ref     : (C, P)       lane-dense input activation, P = N*H*W
    # w_ref     : (L, C, 9*C)  per-layer matmul-form conv weights (MATMUL_DTYPE)
    # gamma_ref : (L, C, 1)    BN scale (f32)
    # beta_ref  : (L, C, 1)    BN shift (f32)
    # sel_ref   : (P, Q)       0/1 pool-compaction matrix, Q = P // 4 (f32)
    # o_ref     : (C, Q)       pooled output, lane-dense
    # pm_ref    : (9*C, P)     persistent VMEM im2col scratch (MATMUL_DTYPE)
    C = x_ref.shape[0]
    inv_p = jnp.float32(1.0 / P)

    # Hoist the (1,P)->(C,P) sublane broadcasts out of the layer loop
    # (JAX does not CSE broadcast_in_dim: without this they are re-emitted 9*L times).
    m_all = masks_ref[...]                                        # (9, P)
    mask_b = [jnp.broadcast_to(m_all[t:t + 1, :], (C, P)) for t in range(9)]

    h = x_ref[...]                                                # (C, P) f32
    for l in range(layer_count):
        # ---- 3x3 conv (stride 1, pad 1) as a single MXU contraction ----
        # Stream each tap straight into the persistent im2col scratch so only one
        # (C, P) tap is live in vregs at a time (no 9-tap concatenate copy).
        for t, (dy, dx) in enumerate(_TAP_OFFSETS):
            s = dy * W + dx                                       # flat source offset
            shifted = h if s == 0 else jnp.roll(h, -s, axis=1)
            pm_ref[t * C:(t + 1) * C, :] = (shifted * mask_b[t]).astype(MATMUL_DTYPE)
        acc = jnp.dot(w_ref[l], pm_ref[...],
                      preferred_element_type=jnp.float32)         # (C, P) f32
        # Conv bias intentionally omitted: exactly cancelled by the train-mode BN
        # mean subtraction below.

        # ---- BatchNorm2d, training-mode batch stats (biased var), stats in f32 ----
        s1 = jnp.sum(acc, axis=1, keepdims=True)                  # (C, 1)
        s2 = jnp.sum(acc * acc, axis=1, keepdims=True)            # (C, 1)
        mu = s1 * inv_p
        var = jnp.maximum(s2 * inv_p - mu * mu, 0.0)              # clamp single-pass var
        scale = jax.lax.rsqrt(var + BN_EPS) * gamma_ref[l]        # (C, 1)
        shift = beta_ref[l] - mu * scale                          # folded affine, (C,1)-cheap
        # ---- folded BN affine + ReLU ----
        h = jnp.maximum(acc * scale + shift, 0.0)

    # ---- 2x2 / stride-2 max-pool epilogue ----
    # Window max via 3 lane rolls (for even-y/even-x top-left positions the shifted reads
    # stay inside the 2x2 window, no masking needed), then compact to those positions with
    # one small f32 selection matmul -> lane-dense (C, P//4) output, 4x less writeback.
    h01 = jnp.roll(h, -1, axis=1)           # (y,   x+1)
    h10 = jnp.roll(h, -W, axis=1)           # (y+1, x  )
    h11 = jnp.roll(h, -(W + 1), axis=1)     # (y+1, x+1)
    wm = jnp.maximum(jnp.maximum(h, h01), jnp.maximum(h10, h11))
    o_ref[...] = jnp.dot(wm, sel_ref[...], preferred_element_type=jnp.float32)


def segent_encoder_block(x_nchw, params):
    """Forward pass of SegentEncoderBlock. Input NCHW (PyTorch convention), output NCHW."""
    N, Cin, H, W = x_nchw.shape
    assert H % 2 == 0 and W % 2 == 0
    L = len(params)
    Cout = params[0][0].shape[0]
    # uniform channel count inside the kernel, padded to a multiple of 16 so every bf16
    # tap slab in the im2col scratch is packed-tile aligned (8 would suffice for f32).
    align = 16 if MATMUL_DTYPE == jnp.bfloat16 else 8
    C = ((max(Cin, Cout) + align - 1) // align) * align
    P = N * H * W
    Q = P // 4

    # lane-dense activation (C, N*H*W); pad missing input channels with zeros
    x2d = jnp.transpose(x_nchw, (1, 0, 2, 3)).reshape(Cin, P).astype(jnp.float32)
    if Cin < C:
        x2d = jnp.concatenate([x2d, jnp.zeros((C - Cin, P), jnp.float32)], axis=0)

    # static tap-validity masks, packed lane-dense as (9, P) (implicit zero padding)
    yy = np.tile(np.repeat(np.arange(H), W), N)
    xx = np.tile(np.tile(np.arange(W), H), N)
    masks = np.stack([
        ((yy + dy >= 0) & (yy + dy < H) & (xx + dx >= 0) & (xx + dx < W))
        for dy, dx in _TAP_OFFSETS
    ]).astype(np.float32)                                   # (9, P)
    masks = jnp.asarray(masks)

    # 0/1 pool-compaction matrix: column q has a single 1 at the top-left flat index of
    # pooled window q = (n, y2, x2); exact gather via one MXU op inside the kernel.
    p_idx = (np.arange(N)[:, None, None] * H * W
             + (2 * np.arange(H // 2))[None, :, None] * W
             + (2 * np.arange(W // 2))[None, None, :]).reshape(-1)       # (Q,)
    sel = np.zeros((P, Q), np.float32)
    sel[p_idx, np.arange(Q)] = 1.0
    sel = jnp.asarray(sel)

    # pack per-layer parameters into uniform (L, C, 9*C) bf16 / (L, C, 1) f32 arrays
    w_all, g_all, b_all = [], [], []
    for (w, _bias, gamma, beta) in params:        # w: (Cout, Cin_l, 3, 3) OIHW
        co, ci = w.shape[0], w.shape[1]
        wp = jnp.zeros((C, C, 3, 3), jnp.float32).at[:co, :ci].set(w)
        # (C, C, 3, 3) -> (C, 9*C) with column index = (ky*3+kx)*C + ci  (tap-major)
        w2 = jnp.transpose(wp, (2, 3, 1, 0)).reshape(9 * C, C).T
        w_all.append(w2.astype(MATMUL_DTYPE))
        g_all.append(jnp.concatenate(
            [gamma.astype(jnp.float32), jnp.ones((C - co,), jnp.float32)]).reshape(C, 1))
        b_all.append(jnp.concatenate(
            [beta.astype(jnp.float32), jnp.zeros((C - co,), jnp.float32)]).reshape(C, 1))
        # _bias is unused inside the kernel: exactly cancelled by train-mode BN mean.
    w_all = jnp.stack(w_all)          # (L, C, 9*C) MATMUL_DTYPE
    g_all = jnp.stack(g_all)          # (L, C, 1)   f32
    b_all = jnp.stack(b_all)          # (L, C, 1)   f32

    kern = functools.partial(_fused_encoder_kernel, layer_count=L, W=W, P=P)
    pooled2d = pl.pallas_call(
        kern,
        out_shape=jax.ShapeDtypeStruct((C, Q), jnp.float32),
        grid=(1,),
        in_specs=[
            pl.BlockSpec((9, P), lambda i: (0, 0)),
            pl.BlockSpec((C, P), lambda i: (0, 0)),
            pl.BlockSpec((L, C, 9 * C), lambda i: (0, 0, 0)),
            pl.BlockSpec((L, C, 1), lambda i: (0, 0, 0)),
            pl.BlockSpec((L, C, 1), lambda i: (0, 0, 0)),
            pl.BlockSpec((P, Q), lambda i: (0, 0)),
        ],
        out_specs=pl.BlockSpec((C, Q), lambda i: (0, 0)),
        scratch_shapes=[pltpu.VMEM((9 * C, P), MATMUL_DTYPE)],
        compiler_params=pltpu.CompilerParams(
            dimension_semantics=("arbitrary",)),
    )(masks, x2d, w_all, g_all, b_all, sel)

    # crop padded channels (no-op for encoder blocks where Cout >= Cin) and reshape to NCHW
    pooled = pooled2d[:Cout].reshape(Cout, N, H // 2, W // 2)
    return jnp.transpose(pooled, (1, 0, 2, 3))


def init_params(key, layer_count, in_channels, out_channels):
    """Deterministic synthetic parameters (PyTorch shapes: OIHW conv, per-channel BN)."""
    params = []
    cin = in_channels
    for _ in range(layer_count):
        key, k1, k2, k3, k4 = jax.random.split(key, 5)
        w = 0.1 * jax.random.normal(k1, (out_channels, cin, 3, 3), jnp.float32)
        b = 0.1 * jax.random.normal(k2, (out_channels,), jnp.float32)
        gamma = 1.0 + 0.1 * jax.random.normal(k3, (out_channels,), jnp.float32)
        beta = 0.1 * jax.random.normal(k4, (out_channels,), jnp.float32)
        params.append((w, b, gamma, beta))
        cin = out_channels
    return params


def reference_forward(x_nchw, params):
    """Pure-JAX f32 reference mirroring the PyTorch semantics (conv bias included)."""
    h = x_nchw
    for (w, b, gamma, beta) in params:
        h = jax.lax.conv_general_dilated(
            h, w, window_strides=(1, 1), padding=((1, 1), (1, 1)),
            dimension_numbers=("NCHW", "OIHW", "NCHW"))
        h = h + b.reshape(1, -1, 1, 1)
        mu = jnp.mean(h, axis=(0, 2, 3), keepdims=True)
        var = jnp.mean((h - mu) ** 2, axis=(0, 2, 3), keepdims=True)
        h = (h - mu) * jax.lax.rsqrt(var + BN_EPS)
        h = h * gamma.reshape(1, -1, 1, 1) + beta.reshape(1, -1, 1, 1)
        h = jnp.maximum(h, 0.0)
    N, Cc, H, W = h.shape
    h = jnp.max(h.reshape(N, Cc, H // 2, 2, W // 2, 2), axis=(3, 5))
    return h


if __name__ == "__main__":
    # SegentEncoderBlock(block_number=0, layer_count=2, in_channels=4, out_channels=8)
    layer_count, in_channels, out_channels = 2, 4, 8
    N, H, W = 2, 16, 16

    key = jax.random.PRNGKey(0)
    key, kx = jax.random.split(key)
    x = jax.random.normal(kx, (N, in_channels, H, W), jnp.float32)   # NCHW like PyTorch

    params = init_params(key, layer_count, in_channels, out_channels)

    out = jax.block_until_ready(segent_encoder_block(x, params))
    ref = jax.block_until_ready(reference_forward(x, params))

    assert out.shape == (N, out_channels, H // 2, W // 2), out.shape
    # Tolerance reflects bf16 MXU operands for the conv contraction (the f32 reference is
    # the exact spec); flip MATMUL_DTYPE to jnp.float32 for ~1e-4 agreement.
    tol = 1e-4 if MATMUL_DTYPE == jnp.float32 else 5e-2
    np.testing.assert_allclose(np.asarray(out), np.asarray(ref), atol=tol, rtol=tol)

    print("KERNEL_OK")
</pallas_src>

<mosaic_0001>
module attributes {stable_mosaic.version = 11 : i64} {
  func.func @_fused_encoder_kernel(%arg0: i32, %arg1: memref<9x512xf32, #tpu.memory_space<vmem>>, %arg2: memref<16x512xf32, #tpu.memory_space<vmem>>, %arg3: memref<2x16x144xbf16, #tpu.memory_space<vmem>>, %arg4: memref<2x16x1xf32, #tpu.memory_space<vmem>>, %arg5: memref<2x16x1xf32, #tpu.memory_space<vmem>>, %arg6: memref<512x128xf32, #tpu.memory_space<vmem>>, %arg7: memref<16x128xf32, #tpu.memory_space<vmem>>, %arg8: memref<144x512xbf16, #tpu.memory_space<vmem>>) attributes {dimension_semantics = [#tpu.dimension_semantics<arbitrary>], iteration_bounds = array<i64: 1>, scalar_prefetch = 0 : i64, scratch_operands = 1 : i64, tpu.core_type = #tpu.core_type<tc>, window_params = [{pipeline_mode = #tpu.pipeline_mode<synchronous>, transform_indices = @transform_0, window_bounds = array<i64: 9, 512>}, {pipeline_mode = #tpu.pipeline_mode<synchronous>, transform_indices = @transform_1, window_bounds = array<i64: 16, 512>}, {pipeline_mode = #tpu.pipeline_mode<synchronous>, transform_indices = @transform_2, window_bounds = array<i64: 2, 16, 144>}, {pipeline_mode = #tpu.pipeline_mode<synchronous>, transform_indices = @transform_3, window_bounds = array<i64: 2, 16, 1>}, {pipeline_mode = #tpu.pipeline_mode<synchronous>, transform_indices = @transform_4, window_bounds = array<i64: 2, 16, 1>}, {pipeline_mode = #tpu.pipeline_mode<synchronous>, transform_indices = @transform_5, window_bounds = array<i64: 512, 128>}, {pipeline_mode = #tpu.pipeline_mode<synchronous>, transform_indices = @transform_6, window_bounds = array<i64: 16, 128>}]} {
    %c0 = arith.constant 0 : index
    %c0_0 = arith.constant 0 : index
    %0 = vector.load %arg1[%c0, %c0_0] : memref<9x512xf32, #tpu.memory_space<vmem>>, vector<9x512xf32>
    %1 = vector.extract_strided_slice %0 {offsets = [0, 0], sizes = [1, 512], strides = [1, 1]} : vector<9x512xf32> to vector<1x512xf32>
    %2 = vector.shape_cast %1 : vector<1x512xf32> to vector<1x512xf32>
    %3 = vector.broadcast %2 : vector<1x512xf32> to vector<16x512xf32>
    %4 = vector.extract_strided_slice %0 {offsets = [1, 0], sizes = [1, 512], strides = [1, 1]} : vector<9x512xf32> to vector<1x512xf32>
    %5 = vector.shape_cast %4 : vector<1x512xf32> to vector<1x512xf32>
    %6 = vector.broadcast %5 : vector<1x512xf32> to vector<16x512xf32>
    %7 = vector.extract_strided_slice %0 {offsets = [2, 0], sizes = [1, 512], strides = [1, 1]} : vector<9x512xf32> to vector<1x512xf32>
    %8 = vector.shape_cast %7 : vector<1x512xf32> to vector<1x512xf32>
    %9 = vector.broadcast %8 : vector<1x512xf32> to vector<16x512xf32>
    %10 = vector.extract_strided_slice %0 {offsets = [3, 0], sizes = [1, 512], strides = [1, 1]} : vector<9x512xf32> to vector<1x512xf32>
    %11 = vector.shape_cast %10 : vector<1x512xf32> to vector<1x512xf32>
    %12 = vector.broadcast %11 : vector<1x512xf32> to vector<16x512xf32>
    %13 = vector.extract_strided_slice %0 {offsets = [4, 0], sizes = [1, 512], strides = [1, 1]} : vector<9x512xf32> to vector<1x512xf32>
    %14 = vector.shape_cast %13 : vector<1x512xf32> to vector<1x512xf32>
    %15 = vector.broadcast %14 : vector<1x512xf32> to vector<16x512xf32>
    %16 = vector.extract_strided_slice %0 {offsets = [5, 0], sizes = [1, 512], strides = [1, 1]} : vector<9x512xf32> to vector<1x512xf32>
    %17 = vector.shape_cast %16 : vector<1x512xf32> to vector<1x512xf32>
    %18 = vector.broadcast %17 : vector<1x512xf32> to vector<16x512xf32>
    %19 = vector.extract_strided_slice %0 {offsets = [6, 0], sizes = [1, 512], strides = [1, 1]} : vector<9x512xf32> to vector<1x512xf32>
    %20 = vector.shape_cast %19 : vector<1x512xf32> to vector<1x512xf32>
    %21 = vector.broadcast %20 : vector<1x512xf32> to vector<16x512xf32>
    %22 = vector.extract_strided_slice %0 {offsets = [7, 0], sizes = [1, 512], strides = [1, 1]} : vector<9x512xf32> to vector<1x512xf32>
    %23 = vector.shape_cast %22 : vector<1x512xf32> to vector<1x512xf32>
    %24 = vector.broadcast %23 : vector<1x512xf32> to vector<16x512xf32>
    %25 = vector.extract_strided_slice %0 {offsets = [8, 0], sizes = [1, 512], strides = [1, 1]} : vector<9x512xf32> to vector<1x512xf32>
    %26 = vector.shape_cast %25 : vector<1x512xf32> to vector<1x512xf32>
    %27 = vector.broadcast %26 : vector<1x512xf32> to vector<16x512xf32>
    %c0_1 = arith.constant 0 : index
    %c0_2 = arith.constant 0 : index
    %28 = vector.load %arg2[%c0_1, %c0_2] : memref<16x512xf32, #tpu.memory_space<vmem>>, vector<16x512xf32>
    %29 = vector.extract_strided_slice %28 {offsets = [0, 495], sizes = [16, 17], strides = [1, 1]} : vector<16x512xf32> to vector<16x17xf32>
    %30 = vector.extract_strided_slice %28 {offsets = [0, 0], sizes = [16, 495], strides = [1, 1]} : vector<16x512xf32> to vector<16x495xf32>
    %31 = tpu.concatenate %29, %30 in 1 : vector<16x17xf32>, vector<16x495xf32> -> vector<16x512xf32>
    %32 = arith.mulf %31, %3 : vector<16x512xf32>
    %33 = arith.truncf %32 : vector<16x512xf32> to vector<16x512xbf16>
    %c0_3 = arith.constant 0 : index
    %c0_4 = arith.constant 0 : index
    %34 = vector.load %arg8[%c0_3, %c0_4] : memref<144x512xbf16, #tpu.memory_space<vmem>>, vector<16x512xbf16>
    tpu.vector_store %arg8[%c0_3, %c0_4], %33 {strides = array<i32>} : memref<144x512xbf16, #tpu.memory_space<vmem>>, vector<16x512xbf16>,
    %35 = vector.extract_strided_slice %28 {offsets = [0, 496], sizes = [16, 16], strides = [1, 1]} : vector<16x512xf32> to vector<16x16xf32>
    %36 = vector.extract_strided_slice %28 {offsets = [0, 0], sizes = [16, 496], strides = [1, 1]} : vector<16x512xf32> to vector<16x496xf32>
    %37 = tpu.concatenate %35, %36 in 1 : vector<16x16xf32>, vector<16x496xf32> -> vector<16x512xf32>
    %38 = arith.mulf %37, %6 : vector<16x512xf32>
    %39 = arith.truncf %38 : vector<16x512xf32> to vector<16x512xbf16>
    %c16 = arith.constant 16 : index
    %c0_5 = arith.constant 0 : index
    %40 = vector.load %arg8[%c16, %c0_5] : memref<144x512xbf16, #tpu.memory_space<vmem>>, vector<16x512xbf16>
    tpu.vector_store %arg8[%c16, %c0_5], %39 {strides = array<i32>} : memref<144x512xbf16, #tpu.memory_space<vmem>>, vector<16x512xbf16>,
    %41 = vector.extract_strided_slice %28 {offsets = [0, 497], sizes = [16, 15], strides = [1, 1]} : vector<16x512xf32> to vector<16x15xf32>
    %42 = vector.extract_strided_slice %28 {offsets = [0, 0], sizes = [16, 497], strides = [1, 1]} : vector<16x512xf32> to vector<16x497xf32>
    %43 = tpu.concatenate %41, %42 in 1 : vector<16x15xf32>, vector<16x497xf32> -> vector<16x512xf32>
    %44 = arith.mulf %43, %9 : vector<16x512xf32>
    %45 = arith.truncf %44 : vector<16x512xf32> to vector<16x512xbf16>
    %c32 = arith.constant 32 : index
    %c0_6 = arith.constant 0 : index
    %46 = vector.load %arg8[%c32, %c0_6] : memref<144x512xbf16, #tpu.memory_space<vmem>>, vector<16x512xbf16>
    tpu.vector_store %arg8[%c32, %c0_6], %45 {strides = array<i32>} : memref<144x512xbf16, #tpu.memory_space<vmem>>, vector<16x512xbf16>,
    %47 = vector.extract_strided_slice %28 {offsets = [0, 511], sizes = [16, 1], strides = [1, 1]} : vector<16x512xf32> to vector<16x1xf32>
    %48 = vector.extract_strided_slice %28 {offsets = [0, 0], sizes = [16, 511], strides = [1, 1]} : vector<16x512xf32> to vector<16x511xf32>
    %49 = tpu.concatenate %47, %48 in 1 : vector<16x1xf32>, vector<16x511xf32> -> vector<16x512xf32>
    %50 = arith.mulf %49, %12 : vector<16x512xf32>
    %51 = arith.truncf %50 : vector<16x512xf32> to vector<16x512xbf16>
    %c48 = arith.constant 48 : index
    %c0_7 = arith.constant 0 : index
    %52 = vector.load %arg8[%c48, %c0_7] : memref<144x512xbf16, #tpu.memory_space<vmem>>, vector<16x512xbf16>
    tpu.vector_store %arg8[%c48, %c0_7], %51 {strides = array<i32>} : memref<144x512xbf16, #tpu.memory_space<vmem>>, vector<16x512xbf16>,
    %53 = arith.mulf %28, %15 : vector<16x512xf32>
    %54 = arith.truncf %53 : vector<16x512xf32> to vector<16x512xbf16>
    %c64 = arith.constant 64 : index
    %c0_8 = arith.constant 0 : index
    %55 = vector.load %arg8[%c64, %c0_8] : memref<144x512xbf16, #tpu.memory_space<vmem>>, vector<16x512xbf16>
    tpu.vector_store %arg8[%c64, %c0_8], %54 {strides = array<i32>} : memref<144x512xbf16, #tpu.memory_space<vmem>>, vector<16x512xbf16>,
    %56 = vector.extract_strided_slice %28 {offsets = [0, 1], sizes = [16, 511], strides = [1, 1]} : vector<16x512xf32> to vector<16x511xf32>
    %57 = vector.extract_strided_slice %28 {offsets = [0, 0], sizes = [16, 1], strides = [1, 1]} : vector<16x512xf32> to vector<16x1xf32>
    %58 = tpu.concatenate %56, %57 in 1 : vector<16x511xf32>, vector<16x1xf32> -> vector<16x512xf32>
    %59 = arith.mulf %58, %18 : vector<16x512xf32>
    %60 = arith.truncf %59 : vector<16x512xf32> to vector<16x512xbf16>
    %c80 = arith.constant 80 : index
    %c0_9 = arith.constant 0 : index
    %61 = vector.load %arg8[%c80, %c0_9] : memref<144x512xbf16, #tpu.memory_space<vmem>>, vector<16x512xbf16>
    tpu.vector_store %arg8[%c80, %c0_9], %60 {strides = array<i32>} : memref<144x512xbf16, #tpu.memory_space<vmem>>, vector<16x512xbf16>,
    %62 = vector.extract_strided_slice %28 {offsets = [0, 15], sizes = [16, 497], strides = [1, 1]} : vector<16x512xf32> to vector<16x497xf32>
    %63 = vector.extract_strided_slice %28 {offsets = [0, 0], sizes = [16, 15], strides = [1, 1]} : vector<16x512xf32> to vector<16x15xf32>
    %64 = tpu.concatenate %62, %63 in 1 : vector<16x497xf32>, vector<16x15xf32> -> vector<16x512xf32>
    %65 = arith.mulf %64, %21 : vector<16x512xf32>
    %66 = arith.truncf %65 : vector<16x512xf32> to vector<16x512xbf16>
    %c96 = arith.constant 96 : index
    %c0_10 = arith.constant 0 : index
    %67 = vector.load %arg8[%c96, %c0_10] : memref<144x512xbf16, #tpu.memory_space<vmem>>, vector<16x512xbf16>
    tpu.vector_store %arg8[%c96, %c0_10], %66 {strides = array<i32>} : memref<144x512xbf16, #tpu.memory_space<vmem>>, vector<16x512xbf16>,
    %68 = vector.extract_strided_slice %28 {offsets = [0, 16], sizes = [16, 496], strides = [1, 1]} : vector<16x512xf32> to vector<16x496xf32>
    %69 = vector.extract_strided_slice %28 {offsets = [0, 0], sizes = [16, 16], strides = [1, 1]} : vector<16x512xf32> to vector<16x16xf32>
    %70 = tpu.concatenate %68, %69 in 1 : vector<16x496xf32>, vector<16x16xf32> -> vector<16x512xf32>
    %71 = arith.mulf %70, %24 : vector<16x512xf32>
    %72 = arith.truncf %71 : vector<16x512xf32> to vector<16x512xbf16>
    %c112 = arith.constant 112 : index
    %c0_11 = arith.constant 0 : index
    %73 = vector.load %arg8[%c112, %c0_11] : memref<144x512xbf16, #tpu.memory_space<vmem>>, vector<16x512xbf16>
    tpu.vector_store %arg8[%c112, %c0_11], %72 {strides = array<i32>} : memref<144x512xbf16, #tpu.memory_space<vmem>>, vector<16x512xbf16>,
    %74 = vector.extract_strided_slice %28 {offsets = [0, 17], sizes = [16, 495], strides = [1, 1]} : vector<16x512xf32> to vector<16x495xf32>
    %75 = vector.extract_strided_slice %28 {offsets = [0, 0], sizes = [16, 17], strides = [1, 1]} : vector<16x512xf32> to vector<16x17xf32>
    %76 = tpu.concatenate %74, %75 in 1 : vector<16x495xf32>, vector<16x17xf32> -> vector<16x512xf32>
    %77 = arith.mulf %76, %27 : vector<16x512xf32>
    %78 = arith.truncf %77 : vector<16x512xf32> to vector<16x512xbf16>
    %c128 = arith.constant 128 : index
    %c0_12 = arith.constant 0 : index
    %79 = vector.load %arg8[%c128, %c0_12] : memref<144x512xbf16, #tpu.memory_space<vmem>>, vector<16x512xbf16>
    tpu.vector_store %arg8[%c128, %c0_12], %78 {strides = array<i32>} : memref<144x512xbf16, #tpu.memory_space<vmem>>, vector<16x512xbf16>,
    %c0_13 = arith.constant 0 : index
    %c0_14 = arith.constant 0 : index
    %c0_15 = arith.constant 0 : index
    %80 = vector.load %arg3[%c0_13, %c0_14, %c0_15] : memref<2x16x144xbf16, #tpu.memory_space<vmem>>, vector<1x16x144xbf16>
    %81 = vector.shape_cast %80 : vector<1x16x144xbf16> to vector<16x144xbf16>
    %c0_16 = arith.constant 0 : index
    %c0_17 = arith.constant 0 : index
    %82 = vector.load %arg8[%c0_16, %c0_17] : memref<144x512xbf16, #tpu.memory_space<vmem>>, vector<144x512xbf16>
    %cst = arith.constant dense<0.000000e+00> : vector<16x512xf32>
    %83 = tpu.matmul %81, %82, %cst {dimension_numbers = #tpu.dot_dimension_numbers<[1], [0], [0], [1], [0, 0, 1, 1], [], []>} : vector<16x144xbf16>, vector<144x512xbf16>, vector<16x512xf32> -> vector<16x512xf32>
    %cst_18 = arith.constant dense<0.000000e+00> : vector<16xf32>
    %84 = vector.multi_reduction <add>, %83, %cst_18 [1] : vector<16x512xf32> to vector<16xf32>
    %85 = vector.shape_cast %84 : vector<16xf32> to vector<16x1xf32>
    %86 = arith.mulf %83, %83 : vector<16x512xf32>
    %cst_19 = arith.constant dense<0.000000e+00> : vector<16xf32>
    %87 = vector.multi_reduction <add>, %86, %cst_19 [1] : vector<16x512xf32> to vector<16xf32>
    %88 = vector.shape_cast %87 : vector<16xf32> to vector<16x1xf32>
    %cst_20 = arith.constant 0.001953125 : f32
    %89 = vector.broadcast %cst_20 : f32 to vector<16x1xf32>
    %90 = arith.mulf %85, %89 : vector<16x1xf32>
    %cst_21 = arith.constant 0.001953125 : f32
    %91 = vector.broadcast %cst_21 : f32 to vector<16x1xf32>
    %92 = arith.mulf %88, %91 : vector<16x1xf32>
    %93 = arith.mulf %90, %90 : vector<16x1xf32>
    %94 = arith.subf %92, %93 : vector<16x1xf32>
    %cst_22 = arith.constant 0.000000e+00 : f32
    %95 = vector.broadcast %cst_22 : f32 to vector<16x1xf32>
    %96 = arith.maximumf %94, %95 : vector<16x1xf32>
    %cst_23 = arith.constant 9.99999974E-6 : f32
    %97 = vector.broadcast %cst_23 : f32 to vector<16x1xf32>
    %98 = arith.addf %96, %97 : vector<16x1xf32>
    %99 = math.rsqrt %98 : vector<16x1xf32>
    %c0_24 = arith.constant 0 : index
    %c0_25 = arith.constant 0 : index
    %c0_26 = arith.constant 0 : index
    %100 = vector.load %arg4[%c0_24, %c0_25, %c0_26] : memref<2x16x1xf32, #tpu.memory_space<vmem>>, vector<1x16x1xf32>
    %101 = vector.shape_cast %100 : vector<1x16x1xf32> to vector<16x1xf32>
    %102 = arith.mulf %99, %101 : vector<16x1xf32>
    %c0_27 = arith.constant 0 : index
    %c0_28 = arith.constant 0 : index
    %c0_29 = arith.constant 0 : index
    %103 = vector.load %arg5[%c0_27, %c0_28, %c0_29] : memref<2x16x1xf32, #tpu.memory_space<vmem>>, vector<1x16x1xf32>
    %104 = vector.shape_cast %103 : vector<1x16x1xf32> to vector<16x1xf32>
    %105 = arith.mulf %90, %102 : vector<16x1xf32>
    %106 = arith.subf %104, %105 : vector<16x1xf32>
    %107 = vector.broadcast %102 : vector<16x1xf32> to vector<16x512xf32>
    %108 = arith.mulf %83, %107 : vector<16x512xf32>
    %109 = vector.broadcast %106 : vector<16x1xf32> to vector<16x512xf32>
    %110 = arith.addf %108, %109 : vector<16x512xf32>
    %cst_30 = arith.constant 0.000000e+00 : f32
    %111 = vector.broadcast %cst_30 : f32 to vector<16x512xf32>
    %112 = arith.maximumf %110, %111 : vector<16x512xf32>
    %113 = vector.extract_strided_slice %112 {offsets = [0, 495], sizes = [16, 17], strides = [1, 1]} : vector<16x512xf32> to vector<16x17xf32>
    %114 = vector.extract_strided_slice %112 {offsets = [0, 0], sizes = [16, 495], strides = [1, 1]} : vector<16x512xf32> to vector<16x495xf32>
    %115 = tpu.concatenate %113, %114 in 1 : vector<16x17xf32>, vector<16x495xf32> -> vector<16x512xf32>
    %116 = arith.mulf %115, %3 : vector<16x512xf32>
    %117 = arith.truncf %116 : vector<16x512xf32> to vector<16x512xbf16>
    %c0_31 = arith.constant 0 : index
    %c0_32 = arith.constant 0 : index
    %118 = vector.load %arg8[%c0_31, %c0_32] : memref<144x512xbf16, #tpu.memory_space<vmem>>, vector<16x512xbf16>
    tpu.vector_store %arg8[%c0_31, %c0_32], %117 {strides = array<i32>} : memref<144x512xbf16, #tpu.memory_space<vmem>>, vector<16x512xbf16>,
    %119 = vector.extract_strided_slice %112 {offsets = [0, 496], sizes = [16, 16], strides = [1, 1]} : vector<16x512xf32> to vector<16x16xf32>
    %120 = vector.extract_strided_slice %112 {offsets = [0, 0], sizes = [16, 496], strides = [1, 1]} : vector<16x512xf32> to vector<16x496xf32>
    %121 = tpu.concatenate %119, %120 in 1 : vector<16x16xf32>, vector<16x496xf32> -> vector<16x512xf32>
    %122 = arith.mulf %121, %6 : vector<16x512xf32>
    %123 = arith.truncf %122 : vector<16x512xf32> to vector<16x512xbf16>
    %c16_33 = arith.constant 16 : index
    %c0_34 = arith.constant 0 : index
    %124 = vector.load %arg8[%c16_33, %c0_34] : memref<144x512xbf16, #tpu.memory_space<vmem>>, vector<16x512xbf16>
    tpu.vector_store %arg8[%c16_33, %c0_34], %123 {strides = array<i32>} : memref<144x512xbf16, #tpu.memory_space<vmem>>, vector<16x512xbf16>,
    %125 = vector.extract_strided_slice %112 {offsets = [0, 497], sizes = [16, 15], strides = [1, 1]} : vector<16x512xf32> to vector<16x15xf32>
    %126 = vector.extract_strided_slice %112 {offsets = [0, 0], sizes = [16, 497], strides = [1, 1]} : vector<16x512xf32> to vector<16x497xf32>
    %127 = tpu.concatenate %125, %126 in 1 : vector<16x15xf32>, vector<16x497xf32> -> vector<16x512xf32>
    %128 = arith.mulf %127, %9 : vector<16x512xf32>
    %129 = arith.truncf %128 : vector<16x512xf32> to vector<16x512xbf16>
    %c32_35 = arith.constant 32 : index
    %c0_36 = arith.constant 0 : index
    %130 = vector.load %arg8[%c32_35, %c0_36] : memref<144x512xbf16, #tpu.memory_space<vmem>>, vector<16x512xbf16>
    tpu.vector_store %arg8[%c32_35, %c0_36], %129 {strides = array<i32>} : memref<144x512xbf16, #tpu.memory_space<vmem>>, vector<16x512xbf16>,
    %131 = vector.extract_strided_slice %112 {offsets = [0, 511], sizes = [16, 1], strides = [1, 1]} : vector<16x512xf32> to vector<16x1xf32>
    %132 = vector.extract_strided_slice %112 {offsets = [0, 0], sizes = [16, 511], strides = [1, 1]} : vector<16x512xf32> to vector<16x511xf32>
    %133 = tpu.concatenate %131, %132 in 1 : vector<16x1xf32>, vector<16x511xf32> -> vector<16x512xf32>
    %134 = arith.mulf %133, %12 : vector<16x512xf32>
    %135 = arith.truncf %134 : vector<16x512xf32> to vector<16x512xbf16>
    %c48_37 = arith.constant 48 : index
    %c0_38 = arith.constant 0 : index
    %136 = vector.load %arg8[%c48_37, %c0_38] : memref<144x512xbf16, #tpu.memory_space<vmem>>, vector<16x512xbf16>
    tpu.vector_store %arg8[%c48_37, %c0_38], %135 {strides = array<i32>} : memref<144x512xbf16, #tpu.memory_space<vmem>>, vector<16x512xbf16>,
    %137 = arith.mulf %112, %15 : vector<16x512xf32>
    %138 = arith.truncf %137 : vector<16x512xf32> to vector<16x512xbf16>
    %c64_39 = arith.constant 64 : index
    %c0_40 = arith.constant 0 : index
    %139 = vector.load %arg8[%c64_39, %c0_40] : memref<144x512xbf16, #tpu.memory_space<vmem>>, vector<16x512xbf16>
    tpu.vector_store %arg8[%c64_39, %c0_40], %138 {strides = array<i32>} : memref<144x512xbf16, #tpu.memory_space<vmem>>, vector<16x512xbf16>,
    %140 = vector.extract_strided_slice %112 {offsets = [0, 1], sizes = [16, 511], strides = [1, 1]} : vector<16x512xf32> to vector<16x511xf32>
    %141 = vector.extract_strided_slice %112 {offsets = [0, 0], sizes = [16, 1], strides = [1, 1]} : vector<16x512xf32> to vector<16x1xf32>
    %142 = tpu.concatenate %140, %141 in 1 : vector<16x511xf32>, vector<16x1xf32> -> vector<16x512xf32>
    %143 = arith.mulf %142, %18 : vector<16x512xf32>
    %144 = arith.truncf %143 : vector<16x512xf32> to vector<16x512xbf16>
    %c80_41 = arith.constant 80 : index
    %c0_42 = arith.constant 0 : index
    %145 = vector.load %arg8[%c80_41, %c0_42] : memref<144x512xbf16, #tpu.memory_space<vmem>>, vector<16x512xbf16>
    tpu.vector_store %arg8[%c80_41, %c0_42], %144 {strides = array<i32>} : memref<144x512xbf16, #tpu.memory_space<vmem>>, vector<16x512xbf16>,
    %146 = vector.extract_strided_slice %112 {offsets = [0, 15], sizes = [16, 497], strides = [1, 1]} : vector<16x512xf32> to vector<16x497xf32>
    %147 = vector.extract_strided_slice %112 {offsets = [0, 0], sizes = [16, 15], strides = [1, 1]} : vector<16x512xf32> to vector<16x15xf32>
    %148 = tpu.concatenate %146, %147 in 1 : vector<16x497xf32>, vector<16x15xf32> -> vector<16x512xf32>
    %149 = arith.mulf %148, %21 : vector<16x512xf32>
    %150 = arith.truncf %149 : vector<16x512xf32> to vector<16x512xbf16>
    %c96_43 = arith.constant 96 : index
    %c0_44 = arith.constant 0 : index
    %151 = vector.load %arg8[%c96_43, %c0_44] : memref<144x512xbf16, #tpu.memory_space<vmem>>, vector<16x512xbf16>
    tpu.vector_store %arg8[%c96_43, %c0_44], %150 {strides = array<i32>} : memref<144x512xbf16, #tpu.memory_space<vmem>>, vector<16x512xbf16>,
    %152 = vector.extract_strided_slice %112 {offsets = [0, 16], sizes = [16, 496], strides = [1, 1]} : vector<16x512xf32> to vector<16x496xf32>
    %153 = vector.extract_strided_slice %112 {offsets = [0, 0], sizes = [16, 16], strides = [1, 1]} : vector<16x512xf32> to vector<16x16xf32>
    %154 = tpu.concatenate %152, %153 in 1 : vector<16x496xf32>, vector<16x16xf32> -> vector<16x512xf32>
    %155 = arith.mulf %154, %24 : vector<16x512xf32>
    %156 = arith.truncf %155 : vector<16x512xf32> to vector<16x512xbf16>
    %c112_45 = arith.constant 112 : index
    %c0_46 = arith.constant 0 : index
    %157 = vector.load %arg8[%c112_45, %c0_46] : memref<144x512xbf16, #tpu.memory_space<vmem>>, vector<16x512xbf16>
    tpu.vector_store %arg8[%c112_45, %c0_46], %156 {strides = array<i32>} : memref<144x512xbf16, #tpu.memory_space<vmem>>, vector<16x512xbf16>,
    %158 = vector.extract_strided_slice %112 {offsets = [0, 17], sizes = [16, 495], strides = [1, 1]} : vector<16x512xf32> to vector<16x495xf32>
    %159 = vector.extract_strided_slice %112 {offsets = [0, 0], sizes = [16, 17], strides = [1, 1]} : vector<16x512xf32> to vector<16x17xf32>
    %160 = tpu.concatenate %158, %159 in 1 : vector<16x495xf32>, vector<16x17xf32> -> vector<16x512xf32>
    %161 = arith.mulf %160, %27 : vector<16x512xf32>
    %162 = arith.truncf %161 : vector<16x512xf32> to vector<16x512xbf16>
    %c128_47 = arith.constant 128 : index
    %c0_48 = arith.constant 0 : index
    %163 = vector.load %arg8[%c128_47, %c0_48] : memref<144x512xbf16, #tpu.memory_space<vmem>>, vector<16x512xbf16>
    tpu.vector_store %arg8[%c128_47, %c0_48], %162 {strides = array<i32>} : memref<144x512xbf16, #tpu.memory_space<vmem>>, vector<16x512xbf16>,
    %c1 = arith.constant 1 : index
    %c0_49 = arith.constant 0 : index
    %c0_50 = arith.constant 0 : index
    %164 = vector.load %arg3[%c1, %c0_49, %c0_50] : memref<2x16x144xbf16, #tpu.memory_space<vmem>>, vector<1x16x144xbf16>
    %165 = vector.shape_cast %164 : vector<1x16x144xbf16> to vector<16x144xbf16>
    %c0_51 = arith.constant 0 : index
    %c0_52 = arith.constant 0 : index
    %166 = vector.load %arg8[%c0_51, %c0_52] : memref<144x512xbf16, #tpu.memory_space<vmem>>, vector<144x512xbf16>
    %cst_53 = arith.constant dense<0.000000e+00> : vector<16x512xf32>
    %167 = tpu.matmul %165, %166, %cst_53 {dimension_numbers = #tpu.dot_dimension_numbers<[1], [0], [0], [1], [0, 0, 1, 1], [], []>} : vector<16x144xbf16>, vector<144x512xbf16>, vector<16x512xf32> -> vector<16x512xf32>
    %cst_54 = arith.constant dense<0.000000e+00> : vector<16xf32>
    %168 = vector.multi_reduction <add>, %167, %cst_54 [1] : vector<16x512xf32> to vector<16xf32>
    %169 = vector.shape_cast %168 : vector<16xf32> to vector<16x1xf32>
    %170 = arith.mulf %167, %167 : vector<16x512xf32>
    %cst_55 = arith.constant dense<0.000000e+00> : vector<16xf32>
    %171 = vector.multi_reduction <add>, %170, %cst_55 [1] : vector<16x512xf32> to vector<16xf32>
    %172 = vector.shape_cast %171 : vector<16xf32> to vector<16x1xf32>
    %cst_56 = arith.constant 0.001953125 : f32
    %173 = vector.broadcast %cst_56 : f32 to vector<16x1xf32>
    %174 = arith.mulf %169, %173 : vector<16x1xf32>
    %cst_57 = arith.constant 0.001953125 : f32
    %175 = vector.broadcast %cst_57 : f32 to vector<16x1xf32>
    %176 = arith.mulf %172, %175 : vector<16x1xf32>
    %177 = arith.mulf %174, %174 : vector<16x1xf32>
    %178 = arith.subf %176, %177 : vector<16x1xf32>
    %cst_58 = arith.constant 0.000000e+00 : f32
    %179 = vector.broadcast %cst_58 : f32 to vector<16x1xf32>
    %180 = arith.maximumf %178, %179 : vector<16x1xf32>
    %cst_59 = arith.constant 9.99999974E-6 : f32
    %181 = vector.broadcast %cst_59 : f32 to vector<16x1xf32>
    %182 = arith.addf %180, %181 : vector<16x1xf32>
    %183 = math.rsqrt %182 : vector<16x1xf32>
    %c1_60 = arith.constant 1 : index
    %c0_61 = arith.constant 0 : index
    %c0_62 = arith.constant 0 : index
    %184 = vector.load %arg4[%c1_60, %c0_61, %c0_62] : memref<2x16x1xf32, #tpu.memory_space<vmem>>, vector<1x16x1xf32>
    %185 = vector.shape_cast %184 : vector<1x16x1xf32> to vector<16x1xf32>
    %186 = arith.mulf %183, %185 : vector<16x1xf32>
    %c1_63 = arith.constant 1 : index
    %c0_64 = arith.constant 0 : index
    %c0_65 = arith.constant 0 : index
    %187 = vector.load %arg5[%c1_63, %c0_64, %c0_65] : memref<2x16x1xf32, #tpu.memory_space<vmem>>, vector<1x16x1xf32>
    %188 = vector.shape_cast %187 : vector<1x16x1xf32> to vector<16x1xf32>
    %189 = arith.mulf %174, %186 : vector<16x1xf32>
    %190 = arith.subf %188, %189 : vector<16x1xf32>
    %191 = vector.broadcast %186 : vector<16x1xf32> to vector<16x512xf32>
    %192 = arith.mulf %167, %191 : vector<16x512xf32>
    %193 = vector.broadcast %190 : vector<16x1xf32> to vector<16x512xf32>
    %194 = arith.addf %192, %193 : vector<16x512xf32>
    %cst_66 = arith.constant 0.000000e+00 : f32
    %195 = vector.broadcast %cst_66 : f32 to vector<16x512xf32>
    %196 = arith.maximumf %194, %195 : vector<16x512xf32>
    %197 = vector.extract_strided_slice %196 {offsets = [0, 1], sizes = [16, 511], strides = [1, 1]} : vector<16x512xf32> to vector<16x511xf32>
    %198 = vector.extract_strided_slice %196 {offsets = [0, 0], sizes = [16, 1], strides = [1, 1]} : vector<16x512xf32> to vector<16x1xf32>
    %199 = tpu.concatenate %197, %198 in 1 : vector<16x511xf32>, vector<16x1xf32> -> vector<16x512xf32>
    %200 = vector.extract_strided_slice %196 {offsets = [0, 16], sizes = [16, 496], strides = [1, 1]} : vector<16x512xf32> to vector<16x496xf32>
    %201 = vector.extract_strided_slice %196 {offsets = [0, 0], sizes = [16, 16], strides = [1, 1]} : vector<16x512xf32> to vector<16x16xf32>
    %202 = tpu.concatenate %200, %201 in 1 : vector<16x496xf32>, vector<16x16xf32> -> vector<16x512xf32>
    %203 = vector.extract_strided_slice %196 {offsets = [0, 17], sizes = [16, 495], strides = [1, 1]} : vector<16x512xf32> to vector<16x495xf32>
    %204 = vector.extract_strided_slice %196 {offsets = [0, 0], sizes = [16, 17], strides = [1, 1]} : vector<16x512xf32> to vector<16x17xf32>
    %205 = tpu.concatenate %203, %204 in 1 : vector<16x495xf32>, vector<16x17xf32> -> vector<16x512xf32>
    %206 = arith.maximumf %196, %199 : vector<16x512xf32>
    %207 = arith.maximumf %202, %205 : vector<16x512xf32>
    %208 = arith.maximumf %206, %207 : vector<16x512xf32>
    %c0_67 = arith.constant 0 : index
    %c0_68 = arith.constant 0 : index
    %209 = vector.load %arg6[%c0_67, %c0_68] : memref<512x128xf32, #tpu.memory_space<vmem>>, vector<512x128xf32>
    %cst_69 = arith.constant dense<0.000000e+00> : vector<16x128xf32>
    %210 = tpu.matmul %208, %209, %cst_69 {dimension_numbers = #tpu.dot_dimension_numbers<[1], [0], [0], [1], [0, 0, 1, 1], [], []>} : vector<16x512xf32>, vector<512x128xf32>, vector<16x128xf32> -> vector<16x128xf32>
    %c0_70 = arith.constant 0 : index
    %c0_71 = arith.constant 0 : index
    %211 = vector.load %arg7[%c0_70, %c0_71] : memref<16x128xf32, #tpu.memory_space<vmem>>, vector<16x128xf32>
    tpu.vector_store %arg7[%c0_70, %c0_71], %210 {strides = array<i32>} : memref<16x128xf32, #tpu.memory_space<vmem>>, vector<16x128xf32>,
    return
  }
  func.func @transform_0(%arg0: i32) -> (i32, i32) {
    %c0_i32 = arith.constant 0 : i32
    %c0_i32_0 = arith.constant 0 : i32
    %c0_i32_1 = arith.constant 0 : i32
    return %c0_i32, %c0_i32_0 : i32, i32
  }
  func.func @transform_1(%arg0: i32) -> (i32, i32) {
    %c0_i32 = arith.constant 0 : i32
    %c0_i32_0 = arith.constant 0 : i32
    %c0_i32_1 = arith.constant 0 : i32
    return %c0_i32, %c0_i32_0 : i32, i32
  }
  func.func @transform_2(%arg0: i32) -> (i32, i32, i32) {
    %c0_i32 = arith.constant 0 : i32
    %c0_i32_0 = arith.constant 0 : i32
    %c0_i32_1 = arith.constant 0 : i32
    %c0_i32_2 = arith.constant 0 : i32
    return %c0_i32, %c0_i32_0, %c0_i32_1 : i32, i32, i32
  }
  func.func @transform_3(%arg0: i32) -> (i32, i32, i32) {
    %c0_i32 = arith.constant 0 : i32
    %c0_i32_0 = arith.constant 0 : i32
    %c0_i32_1 = arith.constant 0 : i32
    %c0_i32_2 = arith.constant 0 : i32
    return %c0_i32, %c0_i32_0, %c0_i32_1 : i32, i32, i32
  }
  func.func @transform_4(%arg0: i32) -> (i32, i32, i32) {
    %c0_i32 = arith.constant 0 : i32
    %c0_i32_0 = arith.constant 0 : i32
    %c0_i32_1 = arith.constant 0 : i32
    %c0_i32_2 = arith.constant 0 : i32
    return %c0_i32, %c0_i32_0, %c0_i32_1 : i32, i32, i32
  }
  func.func @transform_5(%arg0: i32) -> (i32, i32) {
    %c0_i32 = arith.constant 0 : i32
    %c0_i32_0 = arith.constant 0 : i32
    %c0_i32_1 = arith.constant 0 : i32
    return %c0_i32, %c0_i32_0 : i32, i32
  }
  func.func @transform_6(%arg0: i32) -> (i32, i32) {
    %c0_i32 = arith.constant 0 : i32
    %c0_i32_0 = arith.constant 0 : i32
    %c0_i32_1 = arith.constant 0 : i32
    return %c0_i32, %c0_i32_0 : i32, i32
  }
}

</mosaic_0001>

<bundles_post_ra>
// kernel: tpu_custom_call.1
= control target key start
LH: loop header
LB: loop body
LE: loop exit
PB: predicated region body
PF: predicated region fallthrough
CT: control target
= control target key end

     0   :  { %11 = vsyncpa [#allocation4], 0  ;;  %s3405_s0 = inlined_call_operand.vmem [shape: f32[9,512], index: 0, kind: input, shape index: {}]   ;;  %s3406_s1 = inlined_call_operand.hbm [shape: f32[16,512], index: 1, kind: input, shape index: {}]   ;;  %s3407_s2 = inlined_call_operand.hbm [shape: bf16[2,16,144], index: 2, kind: input, shape index: {}]   ;;  %s3408_s3 = inlined_call_operand.vmem [shape: f32[2,16,1], index: 3, kind: input, shape index: {}]   ;;  %s3409_s4 = inlined_call_operand.vmem [shape: f32[2,16,1], index: 4, kind: input, shape index: {}]   ;;  %s3410_s5 = inlined_call_operand.hbm [shape: f32[512,128], index: 5, kind: input, shape index: {}]   ;;  %s3411_s6 = inlined_call_operand.hbm [shape: f32[16,128], index: 6, kind: output, shape index: {}]  }
   0x1   :  { %12 = vsyncpa [#allocation7], 0 }
   0x2   :  { %13 = vsyncpa [#allocation5], 0  ;;  %s2260_s21 = smov [#allocation6]   ;;  %s2166_s25 = scalar_lea.hbm %s3407_s2, 512 }
   0x3   :  { %s33_s22 = sshll.u32 %s2260_s21, 4  ;;  %p2167_p0 = scmp.ne.s32.totalorder %s3407_s2, %s2166_s25  ;;  %s34_s22 = int_to_ptr.vmem [resolvable:$true] %s33_s22 }
   0x4   :  { %p2170_p1 = scmp.lt.u32.totalorder %s2166_s25, %s3407_s2 }
   0x6   :  { %p2172_p2 = pnand %p2170_p1, %p2167_p0 }
   0x8   :  { %2175 = shalt.err (!%p2172_p2)
}
   0x9   :  { %s2176_s30 = scalar_lea.vmem %s34_s22, 512  ;;  %p2181_p4 = scmp.lt.s32.totalorder %s34_s22, %s34_s22 }
   0xa   :  { %p2177_p3 = scmp.ne.s32.totalorder %s34_s22, %s2176_s30  ;;  %p2182_p5 = scmp.lt.s32.totalorder %s2176_s30, %s2176_s30 }
   0xc   :  { %p2183_p6 = por %p2182_p5, %p2181_p4 }
   0xe   :  { %p2184_p7 = pnand %p2183_p6, %p2177_p3 }
  0x10   :  { %2187 = shalt.err (!%p2184_p7)
}
  0x11   :  { %s2261_s7 = smov 128   ;;  %s2262_s8 = smov 8  }
  0x12   :  { %39 = dma.hbm_to_vmem [thread:$0]  %s3407_s2, 512, %s34_s22, [#allocation7], %s2261_s7, %s2261_s7, %s2262_s8  }
  0x13   :  { %s2263_s11 = smov [#allocation3]   ;;  %s2188_s15 = scalar_lea.hbm %s3406_s1, 1024 }
  0x14   :  { %s21_s12 = sshll.u32 %s2263_s11, 4  ;;  %p2189_p8 = scmp.ne.s32.totalorder %s3406_s1, %s2188_s15  ;;  %s22_s12 = int_to_ptr.vmem [resolvable:$true] %s21_s12 }
  0x15   :  { %p2192_p9 = scmp.lt.u32.totalorder %s2188_s15, %s3406_s1 }
  0x17   :  { %p2194_p10 = pnand %p2192_p9, %p2189_p8 }
  0x19   :  { %2197 = shalt.err (!%p2194_p10)
}
  0x1a   :  { %s2198_s20 = scalar_lea.vmem %s22_s12, 1024  ;;  %p2203_p12 = scmp.lt.s32.totalorder %s22_s12, %s22_s12 }
  0x1b   :  { %p2199_p11 = scmp.ne.s32.totalorder %s22_s12, %s2198_s20  ;;  %p2204_p13 = scmp.lt.s32.totalorder %s2198_s20, %s2198_s20 }
  0x1d   :  { %p2205_p0 = por %p2204_p13, %p2203_p12 }
  0x1f   :  { %p2206_p1 = pnand %p2205_p0, %p2199_p11 }
  0x21   :  { %2209 = shalt.err (!%p2206_p1)
}
  0x22   :  { %s2264_s2 = smov 512   ;;  %s2265_s21 = smov 32  }
  0x23   :  { %27 = dma.hbm_to_vmem [thread:$0]  %s3406_s1, 1024, %s22_s12, [#allocation4], %s2264_s2, %s2264_s2, %s2265_s21  }
  0x24   :  { %s2266_s24 = smov [#allocation8]   ;;  %s2210_s28 = scalar_lea.hbm %s3410_s5, 8192 }
  0x25   :  { %s49_s25 = sshll.u32 %s2266_s24, 4  ;;  %p2211_p2 = scmp.ne.s32.totalorder %s3410_s5, %s2210_s28  ;;  %s50_s25 = int_to_ptr.vmem [resolvable:$true] %s49_s25 }
  0x26   :  { %p2214_p3 = scmp.lt.u32.totalorder %s2210_s28, %s3410_s5 }
  0x28   :  { %p2216_p4 = pnand %p2214_p3, %p2211_p2 }
  0x2a   :  { %2219 = shalt.err (!%p2216_p4)
}
  0x2b   :  { %s2220_s11 = scalar_lea.vmem %s50_s25, 8192  ;;  %p2225_p6 = scmp.lt.s32.totalorder %s50_s25, %s50_s25 }
  0x2c   :  { %p2221_p5 = scmp.ne.s32.totalorder %s50_s25, %s2220_s11  ;;  %p2226_p7 = scmp.lt.s32.totalorder %s2220_s11, %s2220_s11 }
  0x2e   :  { %p2227_p8 = por %p2226_p7, %p2225_p6 }
  0x30   :  { %p2228_p9 = pnand %p2227_p8, %p2221_p5 }
  0x32   :  { %2231 = shalt.err (!%p2228_p9)
}
  0x33   :  { %55 = dma.hbm_to_vmem [thread:$0]  %s3410_s5, 8192, %s50_s25, [#allocation7], %s2261_s7, %s2261_s7, %s2262_s8  }
  0x34   :  { %2254 = dma.done.wait [#allocation4], 1024  }
  0x35   :  { %2255 = vsyncadd [#allocation4], 4294966272 }
  0x36   :  { %2256 = dma.done.wait [#allocation7], 8704  }
  0x37   :  { %2257 = vsyncadd [#allocation7], 4294958592  ;;  %v2354_v0 = vld [vmem:[#allocation3 + $0x20] sm:$0xff]  ;;  %s2267_s13 = smov 17   ;;  %v2362_v2 = vld [vmem:[#allocation3 + $0x28] sm:$0xff]  ;;  %s2268_s5 = smov 16   ;;  %v74_v8 = vlaneseq }
  0x38   :  { %v2356_v1 = vld [vmem:[#allocation3] sm:$0xff]  ;;  %246 = vrot.lane.b32.xlu1 %v2354_v0, %s2267_s13  ;;  %v2364_v3 = vld [vmem:[#allocation3 + $0x8] sm:$0xff]  ;;  %v2370_v4 = vld [vmem:[#allocation3 + $0x38] sm:$0xff]  ;;  %s2269_s14 = smov 15   ;;  %s2270_s15 = smov 1   ;;  %vm303_vm0 = vcmask 130048  }
  0x39   :  { %240 = vrot.lane.b32.xlu0 %v2356_v1, %s2267_s13  ;;  %v2372_v5 = vld [vmem:[#allocation3 + $0x18] sm:$0xff]  ;;  %v2378_v6 = vld [vmem:[#allocation3 + $0x30] sm:$0xff]  ;;  %s2271_s16 = smov 127   ;;  %s2272_s17 = smov 113   ;;  %v2482_v9 = vshrl.u32 %v74_v8, 7  ;;  %v2492_v12 = vld [vmem:[%s3405_s0 + $0x8] sm:$0xff] }
  0x3a   :  { %v2380_v7 = vld [vmem:[#allocation3 + $0x10] sm:$0xff]  ;;  %s2273_s18 = smov 112   ;;  %s2274_s19 = smov 111   ;;  %v2154_v11 = vld [vmem:[#allocation6 + $0x4] ss:$8 sps:$4 sm:$0xff]   ;;  %vm252_vm1 = vcmask 138240  }
  0x3b   :  { %v76_v10 = vsub.s32 0, %v2482_v9  ;;  %1923 = vmatprep.mubr.msk.bf16.mxu0 %vm303_vm0, %v2154_v11  ;;  %1924 = vmatprep.mubr.msk.bf16.mxu1 %vm303_vm0, %v2154_v11  ;;  %v2506_v16 = vld [vmem:[%s3405_s0] sm:$0xff]  ;;  %v2522_v24 = vld [vmem:[%s3405_s0 + $0x18] sm:$0xff]  ;;  %v2527_v25 = vld [vmem:[%s3405_s0 + $0x10] sm:$0xff]  ;;  %v92_v38 = vsub.s32 1, %v2482_v9  ;;  %vm354_vm2 = vcmask 121856  }
  0x3c   :  { %248 = vrot.lane.b32.xlu1 %v2362_v2, %s2267_s13  ;;  %vm405_vm3 = vcmask 7168   ;;  %vm470_vm4 = vcmask 1039360   ;;  %vm521_vm5 = vcmask 924672   ;;  %vm572_vm6 = vcmask 916480  }
  0x3d   :  { %242 = vrot.lane.b32.xlu0 %v2364_v3, %s2267_s13  ;;  %v2501_v15 = vrot.slane %v2492_v12, %v76_v10  ;;  %v2517_v23 = vrot.slane %v2506_v16, %v76_v10  ;;  %v2532_v31 = vrot.slane %v2522_v24, %v76_v10  ;;  %v2541_v34 = vrot.slane %v2527_v25, %v76_v10 }
  0x3e   :  { %v2553_v51 = vrot.slane %v2492_v12, %v92_v38  ;;  %v2560_v58 = vrot.slane %v2506_v16, %v92_v38  ;;  %v2567_v11 = vrot.slane %v2527_v25, %v92_v38  ;;  %vm623_vm7 = vcmask 908288  }
  0x40   :  { %230 = vrot.lane.b32.xlu1 %v2370_v4, %s2267_s13 }
  0x41   :  { %228 = vrot.lane.b32.xlu0 %v2372_v5, %s2267_s13 }
  0x44   :  { %250 = vrot.lane.b32.xlu1 %v2378_v6, %s2267_s13 }
  0x45   :  { %244 = vrot.lane.b32.xlu0 %v2380_v7, %s2267_s13 }
  0x48   :  { %293 = vrot.lane.b32.xlu1 %v2364_v3, %s2268_s5 }
  0x49   :  { %291 = vrot.lane.b32.xlu0 %v2356_v1, %s2268_s5 }
  0x4c   :  { %299 = vrot.lane.b32.xlu1 %v2362_v2, %s2268_s5 }
  0x4d   :  { %297 = vrot.lane.b32.xlu0 %v2354_v0, %s2268_s5 }
  0x50   :  { %287 = vrot.lane.b32.xlu1 %v2370_v4, %s2268_s5 }
  0x51   :  { %285 = vrot.lane.b32.xlu0 %v2372_v5, %s2268_s5 }
  0x54   :  { %301 = vrot.lane.b32.xlu1 %v2378_v6, %s2268_s5 }
  0x55   :  { %295 = vrot.lane.b32.xlu0 %v2380_v7, %s2268_s5 }
  0x58   :  { %344 = vrot.lane.b32.xlu1 %v2364_v3, %s2269_s14 }
  0x59   :  { %342 = vrot.lane.b32.xlu0 %v2356_v1, %s2269_s14 }
  0x5c   :  { %350 = vrot.lane.b32.xlu1 %v2362_v2, %s2269_s14 }
  0x5d   :  { %348 = vrot.lane.b32.xlu0 %v2354_v0, %s2269_s14 }
  0x60   :  { %338 = vrot.lane.b32.xlu1 %v2370_v4, %s2269_s14 }
  0x61   :  { %336 = vrot.lane.b32.xlu0 %v2372_v5, %s2269_s14 }
  0x64   :  { %352 = vrot.lane.b32.xlu1 %v2378_v6, %s2269_s14 }
  0x65   :  { %346 = vrot.lane.b32.xlu0 %v2380_v7, %s2269_s14 }
  0x68   :  { %395 = vrot.lane.b32.xlu1 %v2364_v3, %s2270_s15 }
  0x69   :  { %393 = vrot.lane.b32.xlu0 %v2356_v1, %s2270_s15 }
  0x6c   :  { %401 = vrot.lane.b32.xlu1 %v2362_v2, %s2270_s15 }
  0x6d   :  { %399 = vrot.lane.b32.xlu0 %v2354_v0, %s2270_s15 }
  0x70   :  { %389 = vrot.lane.b32.xlu1 %v2370_v4, %s2270_s15 }
  0x71   :  { %387 = vrot.lane.b32.xlu0 %v2372_v5, %s2270_s15 }
  0x74   :  { %403 = vrot.lane.b32.xlu1 %v2378_v6, %s2270_s15 }
  0x75   :  { %397 = vrot.lane.b32.xlu0 %v2380_v7, %s2270_s15 }
  0x78   :  { %458 = vrot.lane.b32.xlu1 %v2380_v7, %s2271_s16 }
  0x79   :  { %456 = vrot.lane.b32.xlu0 %v2364_v3, %s2271_s16 }
  0x7c   :  { %466 = vrot.lane.b32.xlu1 %v2378_v6, %s2271_s16 }
  0x7d   :  { %464 = vrot.lane.b32.xlu0 %v2362_v2, %s2271_s16 }
  0x80   :  { %462 = vrot.lane.b32.xlu1 %v2354_v0, %s2271_s16 }
  0x81   :  { %454 = vrot.lane.b32.xlu0 %v2356_v1, %s2271_s16 }
  0x84   :  { %468 = vrot.lane.b32.xlu1 %v2370_v4, %s2271_s16 }
  0x85   :  { %460 = vrot.lane.b32.xlu0 %v2372_v5, %s2271_s16 }
  0x88   :  { %509 = vrot.lane.b32.xlu1 %v2380_v7, %s2272_s17 }
  0x89   :  { %507 = vrot.lane.b32.xlu0 %v2364_v3, %s2272_s17 }
  0x8c   :  { %517 = vrot.lane.b32.xlu1 %v2378_v6, %s2272_s17 }
  0x8d   :  { %515 = vrot.lane.b32.xlu0 %v2362_v2, %s2272_s17 }
  0x90   :  { %513 = vrot.lane.b32.xlu1 %v2354_v0, %s2272_s17 }
  0x91   :  { %505 = vrot.lane.b32.xlu0 %v2356_v1, %s2272_s17 }
  0x94   :  { %519 = vrot.lane.b32.xlu1 %v2370_v4, %s2272_s17 }
  0x95   :  { %511 = vrot.lane.b32.xlu0 %v2372_v5, %s2272_s17 }
  0x98   :  { %560 = vrot.lane.b32.xlu1 %v2380_v7, %s2273_s18 }
  0x99   :  { %558 = vrot.lane.b32.xlu0 %v2364_v3, %s2273_s18 }
  0x9c   :  { %568 = vrot.lane.b32.xlu1 %v2378_v6, %s2273_s18 }
  0x9d   :  { %566 = vrot.lane.b32.xlu0 %v2362_v2, %s2273_s18 }
  0xa0   :  { %564 = vrot.lane.b32.xlu1 %v2354_v0, %s2273_s18 }
  0xa1   :  { %556 = vrot.lane.b32.xlu0 %v2356_v1, %s2273_s18 }
  0xa4   :  { %570 = vrot.lane.b32.xlu1 %v2370_v4, %s2273_s18 }
  0xa5   :  { %562 = vrot.lane.b32.xlu0 %v2372_v5, %s2273_s18 }
  0xa8   :  { %611 = vrot.lane.b32.xlu1 %v2380_v7, %s2274_s19 }
  0xa9   :  { %609 = vrot.lane.b32.xlu0 %v2364_v3, %s2274_s19 }
  0xaa   :  { %v247_v13 = vpop.permute.xlu1 %246 }
  0xab   :  { %v241_v14 = vpop.permute.xlu0 %240 }
  0xac   :  { %619 = vrot.lane.b32.xlu1 %v2378_v6, %s2274_s19 }
  0xad   :  { %617 = vrot.lane.b32.xlu0 %v2362_v2, %s2274_s19 }
  0xae   :  { %v249_v17 = vpop.permute.xlu1 %248 }
  0xaf   :  { %v243_v18 = vpop.permute.xlu0 %242  ;;  %v256_v20 = vsel %vm252_vm1, %v247_v13, %v249_v17 }
  0xb0   :  { %v253_v19 = vsel %vm252_vm1, %v241_v14, %v243_v18  ;;  %615 = vrot.lane.b32.xlu1 %v2354_v0, %s2274_s19  ;;  %v274_v22 = vmul.f32 %v256_v20, %v2501_v15 }
  0xb1   :  { %607 = vrot.lane.b32.xlu0 %v2356_v1, %s2274_s19  ;;  %v270_v21 = vmul.f32 %v253_v19, %v2501_v15  ;;  %v108_v19 = vsub.s32 2, %v2482_v9 }
  0xb2   :  { %v231_v26 = vpop.permute.xlu1 %230 }
  0xb3   :  { %v229_v27 = vpop.permute.xlu0 %228  ;;  %v278_v28 = vpack.c.bf16 %v274_v22, %v270_v21  ;;  %v268_v29 = vsel %vm252_vm1, %v231_v26, %v247_v13  ;;  %v2570_v13 = vrot.slane %v2522_v24, %v92_v38 }
  0xb4   :  { %v267_v30 = vsel %vm252_vm1, %v229_v27, %v241_v14  ;;  %621 = vrot.lane.b32.xlu1 %v2370_v4, %s2274_s19  ;;  %v273_v33 = vmul.f32 %v268_v29, %v2517_v23 }
  0xb5   :  { %613 = vrot.lane.b32.xlu0 %v2372_v5, %s2274_s19  ;;  %v269_v32 = vmul.f32 %v267_v30, %v2517_v23  ;;  %708 = vmatprep.subr.bf16.mxu0 %v278_v28 }
  0xb6   :  { %v251_v35 = vpop.permute.xlu1 %250 }
  0xb7   :  { %v245_v36 = vpop.permute.xlu0 %244  ;;  %v277_v37 = vpack.c.bf16 %v273_v33, %v269_v32  ;;  %v257_v39 = vsel %vm252_vm1, %v249_v17, %v251_v35  ;;  %v258_v42 = vsel %vm252_vm1, %v251_v35, %v231_v26 }
  0xb8   :  { %v254_v40 = vsel %vm252_vm1, %v243_v18, %v245_v36  ;;  %v255_v41 = vsel %vm252_vm1, %v245_v36, %v229_v27  ;;  %v276_v44 = vmul.f32 %v258_v42, %v2532_v31  ;;  %v275_v46 = vmul.f32 %v257_v39, %v2541_v34 }
  0xb9   :  { %709 = vmatpush1.bf16.msra.mxu0 %v277_v37  ;;  %v272_v43 = vmul.f32 %v255_v41, %v2532_v31  ;;  %v271_v45 = vmul.f32 %v254_v40, %v2541_v34  ;;  %v2582_v37 = vrot.slane %v2492_v12, %v108_v19 }
  0xba   :  { %v294_v47 = vpop.permute.xlu1 %293 }
  0xbb   :  { %v292_v48 = vpop.permute.xlu0 %291  ;;  %v280_v49 = vpack.c.bf16 %v276_v44, %v272_v43  ;;  %v279_v50 = vpack.c.bf16 %v275_v46, %v271_v45  ;;  %v2589_v44 = vrot.slane %v2506_v16, %v108_v19 }
  0xbc   :  { %v304_v52 = vsel %vm303_vm0, %v292_v48, %v294_v47 }
  0xbd   :  { %751 = vmatprep.subr.bf16.mxu1 %v280_v49  ;;  %v321_v56 = vmul.f32 %v304_v52, %v2553_v51 }
  0xbe   :  { %752 = vmatpush1.bf16.msra.mxu1 %v279_v50  ;;  %v300_v53 = vpop.permute.xlu1 %299 }
  0xbf   :  { %v298_v54 = vpop.permute.xlu0 %297 }
  0xc0   :  { %v307_v55 = vsel %vm303_vm0, %v298_v54, %v300_v53 }
  0xc1   :  { %v325_v57 = vmul.f32 %v307_v55, %v2553_v51 }
  0xc2   :  { %v288_v59 = vpop.permute.xlu1 %287 }
  0xc3   :  { %v286_v60 = vpop.permute.xlu0 %285  ;;  %v329_v61 = vpack.c.bf16 %v325_v57, %v321_v56  ;;  %v319_v62 = vsel %vm303_vm0, %v288_v59, %v298_v54  ;;  %v2599_v54 = vrot.slane %v2522_v24, %v108_v19 }
  0xc4   :  { %v318_v63 = vsel %vm303_vm0, %v286_v60, %v292_v48  ;;  %v324_v8 = vmul.f32 %v319_v62, %v2560_v58 }
  0xc5   :  { %v320_v10 = vmul.f32 %v318_v63, %v2560_v58  ;;  %710 = vmatprep.subr.bf16.mxu0 %v329_v61 }
  0xc6   :  { %v302_v14 = vpop.permute.xlu1 %301 }
  0xc7   :  { %v296_v17 = vpop.permute.xlu0 %295  ;;  %v328_v18 = vpack.c.bf16 %v324_v8, %v320_v10  ;;  %v308_v20 = vsel %vm303_vm0, %v300_v53, %v302_v14  ;;  %v309_v21 = vsel %vm303_vm0, %v302_v14, %v288_v59  ;;  %v2596_v53 = vrot.slane %v2527_v25, %v108_v19 }
  0xc8   :  { %v305_v22 = vsel %vm303_vm0, %v294_v47, %v296_v17  ;;  %v306_v26 = vsel %vm303_vm0, %v296_v17, %v286_v60  ;;  %v326_v27 = vmul.f32 %v308_v20, %v2567_v11  ;;  %v327_v28 = vmul.f32 %v309_v21, %v2570_v13 }
  0xc9   :  { %v322_v29 = vmul.f32 %v305_v22, %v2567_v11  ;;  %v323_v30 = vmul.f32 %v306_v26, %v2570_v13  ;;  %711 = vmatpush1.bf16.msra.mxu0 %v328_v18  ;;  %v124_v59 = vsub.s32 3, %v2482_v9  ;;  %v140_v18 = vsub.s32 4, %v2482_v9 }
  0xca   :  { %v345_v32 = vpop.permute.xlu1 %344 }
  0xcb   :  { %v343_v33 = vpop.permute.xlu0 %342  ;;  %v331_v35 = vpack.c.bf16 %v327_v28, %v323_v30  ;;  %v330_v36 = vpack.c.bf16 %v326_v27, %v322_v29  ;;  %v2612_v26 = vrot.slane %v2492_v12, %v124_v59  ;;  %v2616_v28 = vrot.slane %v2492_v12, %v140_v18 }
  0xcc   :  { %v355_v38 = vsel %vm354_vm2, %v343_v33, %v345_v32 }
  0xcd   :  { %753 = vmatprep.subr.bf16.mxu1 %v331_v35  ;;  %v372_v42 = vmul.f32 %v355_v38, %v2582_v37  ;;  %v2625_v38 = vrot.slane %v2506_v16, %v124_v59 }
  0xce   :  { %754 = vmatpush1.bf16.msra.mxu1 %v330_v36  ;;  %v351_v39 = vpop.permute.xlu1 %350 }
  0xcf   :  { %v349_v40 = vpop.permute.xlu0 %348 }
  0xd0   :  { %v358_v41 = vsel %vm354_vm2, %v349_v40, %v351_v39 }
  0xd1   :  { %v376_v43 = vmul.f32 %v358_v41, %v2582_v37 }
  0xd2   :  { %v339_v45 = vpop.permute.xlu1 %338 }
  0xd3   :  { %v337_v46 = vpop.permute.xlu0 %336  ;;  %v380_v47 = vpack.c.bf16 %v376_v43, %v372_v42  ;;  %v370_v48 = vsel %vm354_vm2, %v339_v45, %v349_v40  ;;  %v443_v40 = vmul.f32 %v2362_v2, %v2616_v28 }
  0xd4   :  { %v369_v49 = vsel %vm354_vm2, %v337_v46, %v343_v33  ;;  %v375_v50 = vmul.f32 %v370_v48, %v2589_v44 }
  0xd5   :  { %v371_v52 = vmul.f32 %v369_v49, %v2589_v44  ;;  %712 = vmatprep.subr.bf16.mxu0 %v380_v47  ;;  %v2636_v47 = vrot.slane %v2522_v24, %v140_v18 }
  0xd6   :  { %v353_v55 = vpop.permute.xlu1 %352 }
  0xd7   :  { %v347_v56 = vpop.permute.xlu0 %346  ;;  %v379_v57 = vpack.c.bf16 %v375_v50, %v371_v52  ;;  %v359_v60 = vsel %vm354_vm2, %v351_v39, %v353_v55  ;;  %v360_v61 = vsel %vm354_vm2, %v353_v55, %v339_v45  ;;  %v439_v39 = vmul.f32 %v2364_v3, %v2616_v28 }
  0xd8   :  { %v356_v62 = vsel %vm354_vm2, %v345_v32, %v347_v56  ;;  %v357_v63 = vsel %vm354_vm2, %v347_v56, %v337_v46  ;;  %v377_v8 = vmul.f32 %v359_v60, %v2596_v53  ;;  %v378_v10 = vmul.f32 %v360_v61, %v2599_v54 }
  0xd9   :  { %v373_v14 = vmul.f32 %v356_v62, %v2596_v53  ;;  %v374_v17 = vmul.f32 %v357_v63, %v2599_v54  ;;  %713 = vmatpush1.bf16.msra.mxu0 %v379_v57  ;;  %v2619_v32 = vrot.slane %v2506_v16, %v140_v18  ;;  %v2643_v50 = vrot.slane %v2527_v25, %v124_v59 }
  0xda   :  { %v396_v19 = vpop.permute.xlu1 %395  ;;  %v447_v52 = vpack.c.bf16 %v443_v40, %v439_v39  ;;  %v2650_v55 = vrot.slane %v2527_v25, %v140_v18  ;;  %v441_v62 = vmul.f32 %v2372_v5, %v2636_v47  ;;  %v445_v63 = vmul.f32 %v2370_v4, %v2636_v47 }
  0xdb   :  { %v394_v20 = vpop.permute.xlu0 %393  ;;  %v382_v21 = vpack.c.bf16 %v378_v10, %v374_v17  ;;  %v381_v22 = vpack.c.bf16 %v377_v8, %v373_v14  ;;  %v438_v45 = vmul.f32 %v2356_v1, %v2619_v32  ;;  %v442_v46 = vmul.f32 %v2354_v0, %v2619_v32 }
  0xdc   :  { %v406_v27 = vsel %vm405_vm3, %v394_v20, %v396_v19  ;;  %v2646_v1 = vrot.slane %v2522_v24, %v124_v59  ;;  %v156_v0 = vsub.s32 5, %v2482_v9  ;;  %v440_v4 = vmul.f32 %v2380_v7, %v2650_v55 }
  0xdd   :  { %755 = vmatprep.subr.bf16.mxu1 %v382_v21  ;;  %v423_v35 = vmul.f32 %v406_v27, %v2612_v26  ;;  %v446_v61 = vpack.c.bf16 %v442_v46, %v438_v45  ;;  %v444_v5 = vmul.f32 %v2378_v6, %v2650_v55 }
  0xde   :  { %756 = vmatpush1.bf16.msra.mxu1 %v381_v22  ;;  %v402_v29 = vpop.permute.xlu1 %401 }
  0xdf   :  { %v400_v30 = vpop.permute.xlu0 %399 }
  0xe0   :  { %v409_v33 = vsel %vm405_vm3, %v400_v30, %v402_v29 }
  0xe1   :  { %v427_v36 = vmul.f32 %v409_v33, %v2612_v26  ;;  %v2669_v33 = vrot.slane %v2492_v12, %v156_v0 }
  0xe2   :  { %v390_v41 = vpop.permute.xlu1 %389 }
  0xe3   :  { %v388_v42 = vpop.permute.xlu0 %387  ;;  %v431_v43 = vpack.c.bf16 %v427_v36, %v423_v35  ;;  %v421_v48 = vsel %vm405_vm3, %v390_v41, %v400_v30  ;;  %v449_v30 = vpack.c.bf16 %v445_v63, %v441_v62  ;;  %3448 = vst [vmem:[#allocation13_spill] sm:$0xff] %v2669_v33  ;;  %v448_v36 = vpack.c.bf16 %v444_v5, %v440_v4 }
  0xe4   :  { %v420_v49 = vsel %vm405_vm3, %v388_v42, %v394_v20  ;;  %v426_v3 = vmul.f32 %v421_v48, %v2625_v38  ;;  %v172_v62 = vsub.s32 6, %v2482_v9 }
  0xe5   :  { %v422_v2 = vmul.f32 %v420_v49, %v2625_v38  ;;  %714 = vmatprep.subr.bf16.mxu0 %v431_v43 }
  0xe6   :  { %v404_v56 = vpop.permute.xlu1 %403 }
  0xe7   :  { %v398_v57 = vpop.permute.xlu0 %397  ;;  %v430_v60 = vpack.c.bf16 %v426_v3, %v422_v2  ;;  %v410_v8 = vsel %vm405_vm3, %v402_v29, %v404_v56  ;;  %v411_v59 = vsel %vm405_vm3, %v404_v56, %v390_v41  ;;  %v2686_v56 = vrot.slane %v2522_v24, %v156_v0 }
  0xe8   :  { %v407_v10 = vsel %vm405_vm3, %v396_v19, %v398_v57  ;;  %v408_v14 = vsel %vm405_vm3, %v398_v57, %v388_v42  ;;  %v428_v17 = vmul.f32 %v410_v8, %v2643_v50  ;;  %v429_v18 = vmul.f32 %v411_v59, %v2646_v1 }
  0xe9   :  { %v424_v20 = vmul.f32 %v407_v10, %v2643_v50  ;;  %v425_v21 = vmul.f32 %v408_v14, %v2646_v1  ;;  %715 = vmatpush1.bf16.msra.mxu0 %v430_v60  ;;  %v2676_v42 = vrot.slane %v2506_v16, %v156_v0  ;;  %3451 = vst [vmem:[#allocation16_spill] sm:$0xff] %v2686_v56 }
  0xea   :  { %716 = vmatprep.subr.bf16.mxu0 %v447_v52  ;;  %v459_v22 = vpop.permute.xlu1 %458  ;;  %v2683_v52 = vrot.slane %v2527_v25, %v156_v0 }
  0xeb   :  { %v457_v19 = vpop.permute.xlu0 %456  ;;  %v433_v27 = vpack.c.bf16 %v429_v18, %v425_v21  ;;  %v432_v29 = vpack.c.bf16 %v428_v17, %v424_v20  ;;  %3449 = vst [vmem:[#allocation14_spill] sm:$0xff] %v2676_v42 }
  0xec   :  { %v472_v35 = vsel %vm470_vm4, %v457_v19, %v459_v22  ;;  %3450 = vst [vmem:[#allocation15_spill] sm:$0xff] %v2683_v52 }
  0xed   :  { %757 = vmatprep.subr.bf16.mxu1 %v433_v27  ;;  %717 = vmatpush1.bf16.msra.mxu0 %v446_v61  ;;  %v490_v40 = vmul.f32 %v472_v35, %v2669_v33 }
  0xee   :  { %758 = vmatpush1.bf16.msra.mxu1 %v432_v29  ;;  %v467_v39 = vpop.permute.xlu1 %466 }
  0xef   :  { %v465_v7 = vpop.permute.xlu0 %464  ;;  %759 = vmatprep.subr.bf16.mxu1 %v449_v30 }
  0xf0   :  { %v475_v6 = vsel %vm470_vm4, %v465_v7, %v467_v39 }
  0xf1   :  { %v494_v41 = vmul.f32 %v475_v6, %v2669_v33 }
  0xf2   :  { %760 = vmatpush1.bf16.msra.mxu1 %v448_v36  ;;  %v463_v43 = vpop.permute.xlu1 %462 }
  0xf3   :  { %v455_v45 = vpop.permute.xlu0 %454  ;;  %v498_v46 = vpack.c.bf16 %v494_v41, %v490_v40  ;;  %v474_v48 = vsel %vm470_vm4, %v463_v43, %v465_v7 }
  0xf4   :  { %v471_v49 = vsel %vm470_vm4, %v455_v45, %v457_v19  ;;  %v493_v3 = vmul.f32 %v474_v48, %v2676_v42  ;;  %v2698_v19 = vrot.slane %v2492_v12, %v172_v62  ;;  %v2712_v48 = vrot.slane %v2527_v25, %v172_v62 }
  0xf5   :  { %v489_v2 = vmul.f32 %v471_v49, %v2676_v42  ;;  %718 = vmatprep.subr.bf16.mxu0 %v498_v46  ;;  %v2715_v49 = vrot.slane %v2522_v24, %v172_v62 }
  0xf6   :  { %v469_v57 = vpop.permute.xlu1 %468  ;;  %3452 = vst [vmem:[#allocation17_spill] sm:$0xff] %v2698_v19  ;;  %3454 = vst [vmem:[#allocation19_spill] sm:$0xff] %v2712_v48 }
  0xf7   :  { %v461_v60 = vpop.permute.xlu0 %460  ;;  %v497_v61 = vpack.c.bf16 %v493_v3, %v489_v2  ;;  %v476_v63 = vsel %vm470_vm4, %v467_v39, %v469_v57  ;;  %v488_v8 = vsel %vm470_vm4, %v469_v57, %v463_v43  ;;  %v2705_v39 = vrot.slane %v2506_v16, %v172_v62  ;;  %3455 = vst [vmem:[#allocation20_spill] sm:$0xff] %v2715_v49 }
  0xf8   :  { %v473_v59 = vsel %vm470_vm4, %v459_v22, %v461_v60  ;;  %v487_v10 = vsel %vm470_vm4, %v461_v60, %v455_v45  ;;  %v495_v14 = vmul.f32 %v476_v63, %v2683_v52  ;;  %v496_v17 = vmul.f32 %v488_v8, %v2686_v56 }
  0xf9   :  { %v491_v0 = vmul.f32 %v473_v59, %v2683_v52  ;;  %v492_v18 = vmul.f32 %v487_v10, %v2686_v56  ;;  %719 = vmatpush1.bf16.msra.mxu0 %v497_v61  ;;  %3453 = vst [vmem:[#allocation18_spill] sm:$0xff] %v2705_v39  ;;  %v188_v60 = vsub.s32 7, %v2482_v9 }
  0xfa   :  { %v510_v20 = vpop.permute.xlu1 %509 }
  0xfb   :  { %v508_v21 = vpop.permute.xlu0 %507  ;;  %v500_v4 = vpack.c.bf16 %v496_v17, %v492_v18  ;;  %v499_v5 = vpack.c.bf16 %v495_v14, %v491_v0 }
  0xfc   :  { %v523_v22 = vsel %vm521_vm5, %v508_v21, %v510_v20 }
  0xfd   :  { %761 = vmatprep.subr.bf16.mxu1 %v500_v4  ;;  %v541_v35 = vmul.f32 %v523_v22, %v2698_v19  ;;  %v2727_v4 = vrot.slane %v2492_v12, %v188_v60 }
  0xfe   :  { %762 = vmatpush1.bf16.msra.mxu1 %v499_v5  ;;  %v518_v27 = vpop.permute.xlu1 %517 }
  0xff   :  { %v516_v29 = vpop.permute.xlu0 %515  ;;  %3456 = vst [vmem:[#allocation21_spill] sm:$0xff] %v2727_v4 }
 0x100   :  { %v526_v30 = vsel %vm521_vm5, %v516_v29, %v518_v27 }
 0x101   :  { %v545_v36 = vmul.f32 %v526_v30, %v2698_v19 }
 0x102   :  { %v514_v7 = vpop.permute.xlu1 %513 }
 0x103   :  { %v506_v6 = vpop.permute.xlu0 %505  ;;  %v549_v40 = vpack.c.bf16 %v545_v36, %v541_v35  ;;  %v525_v41 = vsel %vm521_vm5, %v514_v7, %v516_v29  ;;  %v2734_v35 = vrot.slane %v2506_v16, %v188_v60 }
 0x104   :  { %v522_v43 = vsel %vm521_vm5, %v506_v6, %v508_v21  ;;  %v544_v45 = vmul.f32 %v525_v41, %v2705_v39 }
 0x105   :  { %v540_v46 = vmul.f32 %v522_v43, %v2705_v39  ;;  %720 = vmatprep.subr.bf16.mxu0 %v549_v40  ;;  %3457 = vst [vmem:[#allocation22_spill] sm:$0xff] %v2734_v35 }
 0x106   :  { %v520_v3 = vpop.permute.xlu1 %519 }
 0x107   :  { %v512_v2 = vpop.permute.xlu0 %511  ;;  %v548_v57 = vpack.c.bf16 %v544_v45, %v540_v46  ;;  %v527_v61 = vsel %vm521_vm5, %v518_v27, %v520_v3  ;;  %v539_v63 = vsel %vm521_vm5, %v520_v3, %v514_v7  ;;  %v2741_v45 = vrot.slane %v2527_v25, %v188_v60 }
 0x108   :  { %v524_v8 = vsel %vm521_vm5, %v510_v20, %v512_v2  ;;  %v538_v59 = vsel %vm521_vm5, %v512_v2, %v506_v6  ;;  %v546_v10 = vmul.f32 %v527_v61, %v2712_v48  ;;  %v547_v14 = vmul.f32 %v539_v63, %v2715_v49 }
 0x109   :  { %v542_v62 = vmul.f32 %v524_v8, %v2712_v48  ;;  %v543_v17 = vmul.f32 %v538_v59, %v2715_v49  ;;  %721 = vmatpush1.bf16.msra.mxu0 %v548_v57  ;;  %3458 = vst [vmem:[#allocation23_spill] sm:$0xff] %v2741_v45  ;;  %v2744_v46 = vrot.slane %v2522_v24, %v188_v60 }
 0x10a   :  { %v561_v0 = vpop.permute.xlu1 %560 }
 0x10b   :  { %v559_v9 = vpop.permute.xlu0 %558  ;;  %v551_v18 = vpack.c.bf16 %v547_v14, %v543_v17  ;;  %v550_v21 = vpack.c.bf16 %v546_v10, %v542_v62  ;;  %3459 = vst [vmem:[#allocation24_spill] sm:$0xff] %v2744_v46 }
 0x10c   :  { %v574_v20 = vsel %vm572_vm6, %v559_v9, %v561_v0 }
 0x10d   :  { %763 = vmatprep.subr.bf16.mxu1 %v551_v18  ;;  %v592_v29 = vmul.f32 %v574_v20, %v2727_v4 }
 0x10e   :  { %764 = vmatpush1.bf16.msra.mxu1 %v550_v21  ;;  %v569_v5 = vpop.permute.xlu1 %568 }
 0x10f   :  { %v567_v22 = vpop.permute.xlu0 %566 }
 0x110   :  { %v577_v27 = vsel %vm572_vm6, %v567_v22, %v569_v5 }
 0x111   :  { %v596_v30 = vmul.f32 %v577_v27, %v2727_v4  ;;  %v2766_v27 = vld [vmem:[%s3405_s0 + $0x20] ss:$0 sm:$0xff] }
 0x112   :  { %v565_v36 = vpop.permute.xlu1 %564  ;;  %3461 = vst [vmem:[#allocation26_spill] sm:$0xff] %v2766_v27 }
 0x113   :  { %v557_v7 = vpop.permute.xlu0 %556  ;;  %v600_v6 = vpack.c.bf16 %v596_v30, %v592_v29  ;;  %v576_v12 = vsel %vm572_vm6, %v565_v36, %v567_v22 }
 0x114   :  { %v573_v40 = vsel %vm572_vm6, %v557_v7, %v559_v9  ;;  %v595_v41 = vmul.f32 %v576_v12, %v2734_v35 }
 0x115   :  { %v591_v43 = vmul.f32 %v573_v40, %v2734_v35  ;;  %722 = vmatprep.subr.bf16.mxu0 %v600_v6 }
 0x116   :  { %v571_v16 = vpop.permute.xlu1 %570 }
 0x117   :  { %v563_v3 = vpop.permute.xlu0 %562  ;;  %v599_v2 = vpack.c.bf16 %v595_v41, %v591_v43  ;;  %v578_v57 = vsel %vm572_vm6, %v569_v5, %v571_v16  ;;  %v590_v61 = vsel %vm572_vm6, %v571_v16, %v565_v36  ;;  %v2775_v41 = vld [vmem:[%s3405_s0 + $0x30] ss:$0 sm:$0xff]  ;;  %v2780_v43 = vld [vmem:[%s3405_s0 + $0x38] ss:$0 sm:$0xff] }
 0x118   :  { %v575_v63 = vsel %vm572_vm6, %v561_v0, %v563_v3  ;;  %v589_v8 = vsel %vm572_vm6, %v563_v3, %v557_v7  ;;  %v597_v59 = vmul.f32 %v578_v57, %v2741_v45  ;;  %v598_v10 = vmul.f32 %v590_v61, %v2744_v46  ;;  %v2757_v0 = vld [vmem:[%s3405_s0 + $0x28] ss:$0 sm:$0xff]  ;;  %3462 = vst [vmem:[#allocation27_spill] sm:$0xff] %v2775_v41 }
 0x119   :  { %v593_v25 = vmul.f32 %v575_v63, %v2741_v45  ;;  %v594_v24 = vmul.f32 %v589_v8, %v2744_v46  ;;  %723 = vmatpush1.bf16.msra.mxu0 %v599_v2  ;;  %3460 = vst [vmem:[#allocation25_spill] sm:$0xff] %v2757_v0  ;;  %3463 = vst [vmem:[#allocation28_spill] sm:$0xff] %v2780_v43 }
 0x11a   :  { %v612_v60 = vpop.permute.xlu1 %611 }
 0x11b   :  { %v610_v14 = vpop.permute.xlu0 %609  ;;  %v602_v62 = vpack.c.bf16 %v598_v10, %v594_v24  ;;  %v601_v17 = vpack.c.bf16 %v597_v59, %v593_v25  ;;  %v2152_v59 = vld [vmem:[#allocation6] ss:$8 sps:$4 sm:$0xff]  }
 0x11c   :  { %v625_v9 = vsel %vm623_vm7, %v610_v14, %v612_v60 }
 0x11d   :  { %765 = vmatprep.subr.bf16.mxu1 %v602_v62  ;;  %v643_v5 = vmul.f32 %v2757_v0, %v625_v9 }
 0x11e   :  { %766 = vmatpush1.bf16.msra.mxu1 %v601_v17  ;;  %v620_v18 = vpop.permute.xlu1 %619 }
 0x11f   :  { %v618_v21 = vpop.permute.xlu0 %617 }
 0x120   :  { %v628_v20 = vsel %vm623_vm7, %v618_v21, %v620_v18 }
 0x121   :  { %v647_v22 = vmul.f32 %v2757_v0, %v628_v20 }
 0x122   :  { %v616_v29 = vpop.permute.xlu1 %615 }
 0x123   :  { %v608_v30 = vpop.permute.xlu0 %607  ;;  %v651_v36 = vpack.c.bf16 %v647_v22, %v643_v5  ;;  %v627_v7 = vsel %vm623_vm7, %v616_v29, %v618_v21 }
 0x124   :  { %v624_v6 = vsel %vm623_vm7, %v608_v30, %v610_v14  ;;  %v646_v12 = vmul.f32 %v2766_v27, %v627_v7 }
 0x125   :  { %v642_v40 = vmul.f32 %v2766_v27, %v624_v6  ;;  %724 = vmatprep.subr.bf16.mxu0 %v651_v36 }
 0x126   :  { %v622_v16 = vpop.permute.xlu1 %621 }
 0x127   :  { %v614_v3 = vpop.permute.xlu0 %613  ;;  %v650_v2 = vpack.c.bf16 %v646_v12, %v642_v40  ;;  %v629_v57 = vsel %vm623_vm7, %v620_v18, %v622_v16  ;;  %v641_v61 = vsel %vm623_vm7, %v622_v16, %v616_v29 }
 0x128   :  { %v626_v63 = vsel %vm623_vm7, %v612_v60, %v614_v3  ;;  %v640_v8 = vsel %vm623_vm7, %v614_v3, %v608_v30  ;;  %v648_v10 = vmul.f32 %v2775_v41, %v629_v57  ;;  %v649_v25 = vmul.f32 %v2780_v43, %v641_v61 }
 0x129   :  { %v644_v24 = vmul.f32 %v2775_v41, %v626_v63  ;;  %v645_v14 = vmul.f32 %v2780_v43, %v640_v8  ;;  %725 = vmatpush1.bf16.msra.mxu0 %v650_v2 }
 0x12b   :  { %v653_v62 = vpack.c.bf16 %v649_v25, %v645_v14  ;;  %v652_v17 = vpack.c.bf16 %v648_v10, %v644_v24 }
 0x12c   :  { %741 = vmatmul.mubr.bf16.vlgmr.msra.gmra.mrb[0].mxu0 %v2152_v59 }
 0x12d   :  { %767 = vmatprep.subr.bf16.mxu1 %v653_v62 }
 0x12e   :  { %768 = vmatpush1.bf16.msra.mxu1 %v652_v17 }
 0x131   :  { %784 = vmatmul.mubr.bf16.vlgmr.msra.gmra.mrb[0].mxu1 %v2152_v59 }
 0x1ff   :  { %v2790_v9 = vpop.f32.mrb[0].mxu0 }
 0x200   :  { %v804_v60 = vmul.f32 %v2790_v9, %v2790_v9  ;;  %v2794_v18 = vpop.f32.mrb[1].mxu0 }
 0x201   :  { %v794_v21 = vadd.f32 %v2794_v18, %v2790_v9  ;;  %v805_v20 = vmul.f32 %v2794_v18, %v2794_v18  ;;  %v2800_v5 = vpop.f32.mrb[2].mxu0 }
 0x202   :  { %v808_v22 = vmul.f32 %v2800_v5, %v2800_v5  ;;  %v2804_v29 = vpop.f32.mrb[3].mxu0 }
 0x203   :  { %v799_v30 = vadd.f32 %v2804_v29, %v2800_v5  ;;  %v809_v36 = vmul.f32 %v2804_v29, %v2804_v29  ;;  %v812_v7 = vadd.f32 %v805_v20, %v804_v60  ;;  %v2275_v60 = vmov 0  }
 0x204   :  { %v785_v6 = vpop.f32.mrb[0].mxu1  ;;  %2090 = vset.pattern.permute.xlu1 %v2275_v60  ;;  %2091 = vset.pattern.permute.xlu0 %v2275_v60  ;;  %v837_v60 = vld [vmem:[%s3408_s3 + $0x8] sm:$0xff] }
 0x205   :  { %v806_v12 = vmul.f32 %v785_v6, %v785_v6  ;;  %v2810_v40 = vpop.f32.mrb[1].mxu1  ;;  %v795_v16 = vadd.f32 %v794_v21, %v785_v6  ;;  %v817_v3 = vadd.f32 %v809_v36, %v808_v22 }
 0x206   :  { %v2812_v2 = vpop.f32.mrb[2].mxu1  ;;  %v807_v57 = vmul.f32 %v2810_v40, %v2810_v40 }
 0x207   :  { %v810_v61 = vmul.f32 %v2812_v2, %v2812_v2  ;;  %v2818_v63 = vpop.f32.mrb[3].mxu1  ;;  %v796_v8 = vadd.f32 %v795_v16, %v2810_v40  ;;  %v800_v59 = vadd.f32 %v799_v30, %v2812_v2  ;;  %v813_v10 = vadd.f32 %v812_v7, %v806_v12 }
 0x208   :  { %v811_v25 = vmul.f32 %v2818_v63, %v2818_v63 }
 0x209   :  { %797 = vadd.xlane.f32.xlu0 %v796_v8  ;;  %v801_v24 = vadd.f32 %v800_v59, %v2818_v63  ;;  %v814_v14 = vadd.f32 %v813_v10, %v807_v57  ;;  %v818_v62 = vadd.f32 %v817_v3, %v810_v61 }
 0x20b   :  { %802 = vadd.xlane.f32.xlu1 %v801_v24  ;;  %v819_v17 = vadd.f32 %v818_v62, %v811_v25  ;;  %v836_v24 = vld [vmem:[%s3408_s3] sm:$0xff] }
 0x20d   :  { %815 = vadd.xlane.f32.xlu0 %v814_v14 }
 0x211   :  { %820 = vadd.xlane.f32.xlu0 %v819_v17  ;;  %v840_v17 = vld [vmem:[%s3409_s4] sm:$0xff] }
 0x296   :  { %v798_v21 = vpop.xlane.xlu0 %797 }
 0x297   :  { %v822_v20 = vmul.f32 0.001953125, %v798_v21 }
 0x298   :  { %v803_v22 = vpop.xlane.xlu1 %802 }
 0x299   :  { %v826_v36 = vmul.f32 %v822_v20, %v822_v20  ;;  %v823_v7 = vmul.f32 0.001953125, %v803_v22 }
 0x29a   :  { %v816_v30 = vpop.xlane.xlu0 %815 }
 0x29b   :  { %v824_v12 = vmul.f32 0.001953125, %v816_v30  ;;  %v827_v43 = vmul.f32 %v823_v7, %v823_v7 }
 0x29d   :  { %v828_v16 = vsub.f32 %v824_v12, %v826_v36  ;;  %v841_v36 = vld [vmem:[%s3409_s4 + $0x8] sm:$0xff] }
 0x29e   :  { %v821_v8 = vpop.xlane.xlu0 %820 }
 0x29f   :  { %v830_v59 = vmax.f32 %v828_v16, 0.0  ;;  %v825_v57 = vmul.f32 0.001953125, %v821_v8 }
 0x2a1   :  { %v832_v3 = vadd.f32 1e-05, %v830_v59  ;;  %v829_v61 = vsub.f32 %v825_v57, %v827_v43 }
 0x2a3   :  { %2158 = vrsqrt.f32 %v832_v3  ;;  %v831_v10 = vmax.f32 %v829_v61, 0.0 }
 0x2a5   :  { %v833_v25 = vadd.f32 1e-05, %v831_v10 }
 0x2a7   :  { %2160 = vrsqrt.f32 %v833_v25 }
 0x2ad   :  { %v2159_v14 = vpop.eup %2158 }
 0x2ae   :  { %v838_v62 = vmul.f32 %v2159_v14, %v836_v24 }
 0x2b0   :  { %848 = vperm.xlu1 %2090, %v838_v62   ;;  %v842_v43 = vmul.f32 %v838_v62, %v822_v20 }
 0x2b1   :  { %v2161_v21 = vpop.eup %2160 }
 0x2b2   :  { %v844_v22 = vsub.f32 %v840_v17, %v842_v43  ;;  %v839_v30 = vmul.f32 %v2161_v21, %v837_v60 }
 0x2b4   :  { %866 = vperm.xlu1 %2090, %v844_v22   ;;  %853 = vperm.xlu0 %2091, %v839_v30   ;;  %v843_v12 = vmul.f32 %v839_v30, %v823_v7 }
 0x2b6   :  { %v845_v16 = vsub.f32 %v841_v36, %v843_v12 }
 0x2b8   :  { %871 = vperm.xlu1 %2090, %v845_v16  }
 0x32f   :  { %v849_v8 = vpop.permute.xlu1 %848 }
 0x330   :  { %v856_v59 = vmul.f32 %v849_v8, %v2790_v9  ;;  %v858_v57 = vmul.f32 %v849_v8, %v785_v6  ;;  %v857_v61 = vmul.f32 %v849_v8, %v2794_v18  ;;  %v859_v62 = vmul.f32 %v849_v8, %v2810_v40 }
 0x333   :  { %v867_v3 = vpop.permute.xlu1 %866  ;;  %v854_v40 = vpop.permute.xlu0 %853 }
 0x334   :  { %v874_v20 = vadd.f32 %v867_v3, %v856_v59  ;;  %v876_v10 = vadd.f32 %v867_v3, %v858_v57  ;;  %v875_v25 = vadd.f32 %v867_v3, %v857_v61  ;;  %v877_v9 = vadd.f32 %v867_v3, %v859_v62  ;;  %v2155_v62 = vld [vmem:[#allocation6 + $0x14] ss:$8 sps:$4 sm:$0xff]  }
 0x335   :  { %v860_v17 = vmul.f32 %v854_v40, %v2800_v5  ;;  %v861_v43 = vmul.f32 %v854_v40, %v2804_v29  ;;  %v863_v5 = vmul.f32 %v854_v40, %v2818_v63  ;;  %v862_v29 = vmul.f32 %v854_v40, %v2812_v2  ;;  %1927 = vmatprep.mubr.msk.bf16.mxu0 %vm303_vm0, %v2155_v62 }
 0x336   :  { %v2839_v24 = vmax.f32 %v874_v20, 0.0  ;;  %v2841_v14 = vmax.f32 %v876_v10, 0.0  ;;  %v2848_v6 = vmax.f32 %v875_v25, 0.0  ;;  %v2854_v18 = vmax.f32 %v877_v9, 0.0  ;;  %1928 = vmatprep.mubr.msk.bf16.mxu1 %vm303_vm0, %v2155_v62 }
 0x337   :  { %v872_v7 = vpop.permute.xlu1 %871 }
 0x338   :  { %3464 = vst [vmem:[#allocation29_spill] sm:$0xff] %v2841_v14  ;;  %908 = vrot.lane.b32.xlu0 %v2841_v14, %s2267_s13  ;;  %904 = vrot.lane.b32.xlu1 %v2839_v24, %s2267_s13  ;;  %v878_v60 = vadd.f32 %v872_v7, %v860_v17  ;;  %v879_v21 = vadd.f32 %v872_v7, %v861_v43 }
 0x339   :  { %v881_v30 = vadd.f32 %v872_v7, %v863_v5  ;;  %v880_v12 = vadd.f32 %v872_v7, %v862_v29 }
 0x33a   :  { %v2890_v22 = vmax.f32 %v878_v60, 0.0  ;;  %v2897_v36 = vmax.f32 %v879_v21, 0.0 }
 0x33b   :  { %v2904_v16 = vmax.f32 %v881_v30, 0.0  ;;  %v2910_v63 = vmax.f32 %v880_v12, 0.0 }
 0x33c   :  { %954 = vrot.lane.b32.xlu0 %v2839_v24, %s2268_s5  ;;  %906 = vrot.lane.b32.xlu1 %v2848_v6, %s2267_s13 }
 0x340   :  { %948 = vrot.lane.b32.xlu0 %v2854_v18, %s2268_s5  ;;  %892 = vrot.lane.b32.xlu1 %v2854_v18, %s2267_s13 }
 0x344   :  { %958 = vrot.lane.b32.xlu0 %v2841_v14, %s2268_s5  ;;  %956 = vrot.lane.b32.xlu1 %v2848_v6, %s2268_s5 }
 0x348   :  { %1004 = vrot.lane.b32.xlu0 %v2839_v24, %s2269_s14  ;;  %1006 = vrot.lane.b32.xlu1 %v2848_v6, %s2269_s14 }
 0x34c   :  { %998 = vrot.lane.b32.xlu0 %v2854_v18, %s2269_s14  ;;  %1056 = vrot.lane.b32.xlu1 %v2848_v6, %s2270_s15 }
 0x350   :  { %1008 = vrot.lane.b32.xlu0 %v2841_v14, %s2269_s14  ;;  %1118 = vrot.lane.b32.xlu1 %v2841_v14, %s2271_s16 }
 0x354   :  { %1054 = vrot.lane.b32.xlu0 %v2839_v24, %s2270_s15  ;;  %1168 = vrot.lane.b32.xlu1 %v2841_v14, %s2272_s17 }
 0x358   :  { %1048 = vrot.lane.b32.xlu0 %v2854_v18, %s2270_s15  ;;  %1218 = vrot.lane.b32.xlu1 %v2841_v14, %s2273_s18 }
 0x35c   :  { %1058 = vrot.lane.b32.xlu0 %v2841_v14, %s2270_s15  ;;  %1268 = vrot.lane.b32.xlu1 %v2841_v14, %s2274_s19 }
 0x360   :  { %1116 = vrot.lane.b32.xlu0 %v2848_v6, %s2271_s16  ;;  %910 = vrot.lane.b32.xlu1 %v2890_v22, %s2267_s13 }
 0x364   :  { %1114 = vrot.lane.b32.xlu0 %v2839_v24, %s2271_s16  ;;  %912 = vrot.lane.b32.xlu1 %v2897_v36, %s2267_s13 }
 0x368   :  { %1120 = vrot.lane.b32.xlu0 %v2854_v18, %s2271_s16  ;;  %894 = vrot.lane.b32.xlu1 %v2904_v16, %s2267_s13 }
 0x36c   :  { %1166 = vrot.lane.b32.xlu0 %v2848_v6, %s2272_s17  ;;  %914 = vrot.lane.b32.xlu1 %v2910_v63, %s2267_s13 }
 0x370   :  { %1164 = vrot.lane.b32.xlu0 %v2839_v24, %s2272_s17  ;;  %962 = vrot.lane.b32.xlu1 %v2897_v36, %s2268_s5 }
 0x374   :  { %1170 = vrot.lane.b32.xlu0 %v2854_v18, %s2272_s17  ;;  %950 = vrot.lane.b32.xlu1 %v2904_v16, %s2268_s5 }
 0x378   :  { %1216 = vrot.lane.b32.xlu0 %v2848_v6, %s2273_s18  ;;  %964 = vrot.lane.b32.xlu1 %v2910_v63, %s2268_s5 }
 0x37c   :  { %1214 = vrot.lane.b32.xlu0 %v2839_v24, %s2273_s18  ;;  %1012 = vrot.lane.b32.xlu1 %v2897_v36, %s2269_s14 }
 0x380   :  { %1220 = vrot.lane.b32.xlu0 %v2854_v18, %s2273_s18  ;;  %1000 = vrot.lane.b32.xlu1 %v2904_v16, %s2269_s14 }
 0x384   :  { %1266 = vrot.lane.b32.xlu0 %v2848_v6, %s2274_s19  ;;  %1014 = vrot.lane.b32.xlu1 %v2910_v63, %s2269_s14 }
 0x388   :  { %960 = vrot.lane.b32.xlu0 %v2890_v22, %s2268_s5  ;;  %1062 = vrot.lane.b32.xlu1 %v2897_v36, %s2270_s15 }
 0x38c   :  { %1010 = vrot.lane.b32.xlu0 %v2890_v22, %s2269_s14  ;;  %1050 = vrot.lane.b32.xlu1 %v2904_v16, %s2270_s15 }
 0x390   :  { %1060 = vrot.lane.b32.xlu0 %v2890_v22, %s2270_s15  ;;  %1064 = vrot.lane.b32.xlu1 %v2910_v63, %s2270_s15 }
 0x394   :  { %1264 = vrot.lane.b32.xlu0 %v2839_v24, %s2274_s19  ;;  %1126 = vrot.lane.b32.xlu1 %v2910_v63, %s2271_s16 }
 0x398   :  { %1124 = vrot.lane.b32.xlu0 %v2897_v36, %s2271_s16  ;;  %1122 = vrot.lane.b32.xlu1 %v2890_v22, %s2271_s16 }
 0x39c   :  { %1174 = vrot.lane.b32.xlu0 %v2897_v36, %s2272_s17  ;;  %1128 = vrot.lane.b32.xlu1 %v2904_v16, %s2271_s16 }
 0x3a0   :  { %1224 = vrot.lane.b32.xlu0 %v2897_v36, %s2273_s18  ;;  %1176 = vrot.lane.b32.xlu1 %v2910_v63, %s2272_s17 }
 0x3a4   :  { %1274 = vrot.lane.b32.xlu0 %v2897_v36, %s2274_s19  ;;  %1172 = vrot.lane.b32.xlu1 %v2890_v22, %s2272_s17 }
 0x3a8   :  { %1270 = vrot.lane.b32.xlu0 %v2854_v18, %s2274_s19  ;;  %1178 = vrot.lane.b32.xlu1 %v2904_v16, %s2272_s17 }
 0x3aa   :  { %v909_v2 = vpop.permute.xlu0 %908  ;;  %v905_v8 = vpop.permute.xlu1 %904 }
 0x3ac   :  { %1226 = vrot.lane.b32.xlu1 %v2910_v63, %s2273_s18 }
 0x3ae   :  { %v955_v59 = vpop.permute.xlu0 %954  ;;  %v907_v57 = vpop.permute.xlu1 %906 }
 0x3af   :  { %v916_v46 = vsel %vm252_vm1, %v905_v8, %v907_v57  ;;  %v917_v42 = vsel %vm252_vm1, %v907_v57, %v909_v2 }
 0x3b0   :  { %1222 = vrot.lane.b32.xlu1 %v2890_v22, %s2273_s18  ;;  %v933_v49 = vmul.f32 %v916_v46, %v2501_v15 }
 0x3b2   :  { %v2980_v3 = vpop.permute.xlu0 %948  ;;  %v893_v61 = vpop.permute.xlu1 %892 }
 0x3b3   :  { %v2984_v20 = vsel %vm303_vm0, %v2980_v3, %v955_v59  ;;  %v918_v33 = vsel %vm252_vm1, %v909_v2, %v893_v61 }
 0x3b4   :  { %1228 = vrot.lane.b32.xlu1 %v2904_v16, %s2273_s18 }
 0x3b6   :  { %v959_v10 = vpop.permute.xlu0 %958  ;;  %v957_v25 = vpop.permute.xlu1 %956 }
 0x3b7   :  { %v2989_v9 = vsel %vm303_vm0, %v955_v59, %v957_v25 }
 0x3b8   :  { %1276 = vrot.lane.b32.xlu1 %v2910_v63, %s2274_s19 }
 0x3ba   :  { %v1005_v40 = vpop.permute.xlu0 %1004  ;;  %v2995_v7 = vpop.permute.xlu1 %1006 }
 0x3bb   :  { %v2999_v17 = vsel %vm354_vm2, %v1005_v40, %v2995_v7 }
 0x3bc   :  { %1272 = vrot.lane.b32.xlu1 %v2890_v22, %s2274_s19 }
 0x3be   :  { %v3003_v60 = vpop.permute.xlu0 %998  ;;  %v3005_v43 = vpop.permute.xlu1 %1056 }
 0x3bf   :  { %v3009_v21 = vsel %vm354_vm2, %v3003_v60, %v1005_v40 }
 0x3c0   :  { %1278 = vrot.lane.b32.xlu1 %v2904_v16, %s2274_s19 }
 0x3c2   :  { %v3013_v5 = vpop.permute.xlu0 %1008  ;;  %v3015_v30 = vpop.permute.xlu1 %1118 }
 0x3c6   :  { %v3017_v29 = vpop.permute.xlu0 %1054  ;;  %v3019_v12 = vpop.permute.xlu1 %1168 }
 0x3c7   :  { %3465 = vst [vmem:[#allocation30_spill] sm:$0xff] %v3019_v12 }
 0x3ca   :  { %v3021_v59 = vpop.permute.xlu0 %1048  ;;  %v3023_v62 = vpop.permute.xlu1 %1218 }
 0x3cb   :  { %3466 = vst [vmem:[#allocation31_spill] sm:$0xff] %v3023_v62  ;;  %v930_v62 = vsel %vm252_vm1, %v893_v61, %v905_v8 }
 0x3cc   :  { %v932_v56 = vmul.f32 %v930_v62, %v2517_v23 }
 0x3ce   :  { %v3025_v41 = vpop.permute.xlu0 %1058  ;;  %v3027_v27 = vpop.permute.xlu1 %1268 }
 0x3cf   :  { %3467 = vst [vmem:[#allocation32_spill] sm:$0xff] %v3027_v27 }
 0x3d2   :  { %v3029_v40 = vpop.permute.xlu0 %1116  ;;  %v911_v0 = vpop.permute.xlu1 %910 }
 0x3d6   :  { %v3032_v45 = vpop.permute.xlu0 %1114  ;;  %v913_v35 = vpop.permute.xlu1 %912 }
 0x3d7   :  { %v919_v4 = vsel %vm252_vm1, %v911_v0, %v913_v35 }
 0x3d8   :  { %v937_v48 = vmul.f32 %v919_v4, %v2501_v15 }
 0x3da   :  { %v3038_v39 = vpop.permute.xlu0 %1120  ;;  %v895_v19 = vpop.permute.xlu1 %894  ;;  %v941_v27 = vpack.c.bf16 %v937_v48, %v933_v49  ;;  %v934_v48 = vmul.f32 %v917_v42, %v2541_v34  ;;  %v935_v49 = vmul.f32 %v918_v33, %v2532_v31  ;;  %v968_v42 = vsel %vm303_vm0, %v959_v10, %v2980_v3 }
 0x3db   :  { %v931_v12 = vsel %vm252_vm1, %v895_v19, %v911_v0  ;;  %v967_v33 = vsel %vm303_vm0, %v957_v25, %v959_v10 }
 0x3dc   :  { %v936_v52 = vmul.f32 %v931_v12, %v2517_v23  ;;  %1365 = vmatprep.subr.bf16.mxu0 %v941_v27  ;;  %v985_v12 = vmul.f32 %v968_v42, %v2570_v13  ;;  %v984_v62 = vmul.f32 %v967_v33, %v2567_v11 }
 0x3de   :  { %v940_v46 = vpack.c.bf16 %v936_v52, %v932_v56  ;;  %v3045_v14 = vpop.permute.xlu0 %1166  ;;  %v915_v15 = vpop.permute.xlu1 %914 }
 0x3df   :  { %v920_v4 = vsel %vm252_vm1, %v913_v35, %v915_v15  ;;  %v921_v8 = vsel %vm252_vm1, %v915_v15, %v895_v19 }
 0x3e0   :  { %v938_v0 = vmul.f32 %v920_v4, %v2541_v34  ;;  %v939_v23 = vmul.f32 %v921_v8, %v2532_v31  ;;  %1366 = vmatpush1.bf16.msra.mxu0 %v940_v46 }
 0x3e2   :  { %v942_v27 = vpack.c.bf16 %v938_v0, %v934_v48  ;;  %v3053_v57 = vpop.permute.xlu0 %1164  ;;  %v963_v52 = vpop.permute.xlu1 %962  ;;  %v943_v56 = vpack.c.bf16 %v939_v23, %v935_v49  ;;  %v1017_v49 = vsel %vm354_vm2, %v2995_v7, %v3013_v5 }
 0x3e4   :  { %1408 = vmatprep.subr.bf16.mxu1 %v943_v56  ;;  %v1034_v56 = vmul.f32 %v1017_v49, %v2596_v53 }
 0x3e5   :  { %1409 = vmatpush1.bf16.msra.mxu1 %v942_v27 }
 0x3e6   :  { %v3055_v2 = vpop.permute.xlu0 %1170  ;;  %v951_v35 = vpop.permute.xlu1 %950 }
 0x3ea   :  { %v3060_v19 = vpop.permute.xlu0 %1216  ;;  %v965_v34 = vpop.permute.xlu1 %964 }
 0x3eb   :  { %v970_v31 = vsel %vm303_vm0, %v963_v52, %v965_v34  ;;  %v971_v61 = vsel %vm303_vm0, %v965_v34, %v951_v35 }
 0x3ec   :  { %v988_v46 = vmul.f32 %v970_v31, %v2567_v11  ;;  %v989_v15 = vmul.f32 %v971_v61, %v2570_v13  ;;  %v1018_v11 = vsel %vm354_vm2, %v3013_v5, %v3003_v60 }
 0x3ed   :  { %v1035_v42 = vmul.f32 %v1018_v11, %v2599_v54  ;;  %v1033_v11 = vmul.f32 %v2999_v17, %v2582_v37 }
 0x3ee   :  { %v992_v4 = vpack.c.bf16 %v988_v46, %v984_v62  ;;  %v3068_v8 = vpop.permute.xlu0 %1214  ;;  %v1013_v3 = vpop.permute.xlu1 %1012  ;;  %v993_v10 = vpack.c.bf16 %v989_v15, %v985_v12  ;;  %v982_v62 = vmul.f32 %v2984_v20, %v2560_v58  ;;  %v983_v46 = vmul.f32 %v2989_v9, %v2553_v51 }
 0x3f0   :  { %1410 = vmatprep.subr.bf16.mxu1 %v993_v10 }
 0x3f1   :  { %1411 = vmatpush1.bf16.msra.mxu1 %v992_v4 }
 0x3f2   :  { %v3070_v25 = vpop.permute.xlu0 %1220  ;;  %v1001_v48 = vpop.permute.xlu1 %1000 }
 0x3f6   :  { %v3078_v0 = vpop.permute.xlu0 %1266  ;;  %v1015_v13 = vpop.permute.xlu1 %1014 }
 0x3f7   :  { %v1020_v23 = vsel %vm354_vm2, %v1013_v3, %v1015_v13  ;;  %v1021_v27 = vsel %vm354_vm2, %v1015_v13, %v1001_v48 }
 0x3f8   :  { %v1038_v33 = vmul.f32 %v1020_v23, %v2596_v53  ;;  %v1039_v34 = vmul.f32 %v1021_v27, %v2599_v54  ;;  %v1066_v54 = vsel %vm405_vm3, %v3017_v29, %v3005_v43 }
 0x3fa   :  { %v1042_v7 = vpack.c.bf16 %v1038_v33, %v1034_v56  ;;  %v961_v31 = vpop.permute.xlu0 %960  ;;  %v1063_v61 = vpop.permute.xlu1 %1062  ;;  %v1043_v12 = vpack.c.bf16 %v1039_v34, %v1035_v42 }
 0x3fb   :  { %v969_v60 = vsel %vm303_vm0, %v961_v31, %v963_v52  ;;  %v981_v5 = vsel %vm303_vm0, %v951_v35, %v961_v31  ;;  %v1080_v52 = vsel %vm405_vm3, %v3021_v59, %v3017_v29  ;;  %v1032_v29 = vmul.f32 %v3009_v21, %v2589_v44 }
 0x3fc   :  { %v986_v15 = vmul.f32 %v981_v5, %v2560_v58  ;;  %v987_v53 = vmul.f32 %v969_v60, %v2553_v51  ;;  %1412 = vmatprep.subr.bf16.mxu1 %v1043_v12  ;;  %v1067_v58 = vsel %vm405_vm3, %v3005_v43, %v3025_v41  ;;  %v1068_v51 = vsel %vm405_vm3, %v3025_v41, %v3021_v59 }
 0x3fd   :  { %1413 = vmatpush1.bf16.msra.mxu1 %v1042_v7  ;;  %v1083_v43 = vmul.f32 %v1066_v54, %v2612_v26  ;;  %v1082_v27 = vmul.f32 %v1080_v52, %v2625_v38  ;;  %v1103_v41 = vmul.f32 %v2897_v36, %v2616_v28  ;;  %v1105_v59 = vmul.f32 %v2904_v16, %v2636_v47 }
 0x3fe   :  { %v990_v35 = vpack.c.bf16 %v986_v15, %v982_v62  ;;  %v1011_v4 = vpop.permute.xlu0 %1010  ;;  %v1051_v20 = vpop.permute.xlu1 %1050  ;;  %v991_v10 = vpack.c.bf16 %v987_v53, %v983_v46  ;;  %v1084_v17 = vmul.f32 %v1067_v58, %v2643_v50  ;;  %v1085_v21 = vmul.f32 %v1068_v51, %v2646_v1 }
 0x3ff   :  { %v1019_v9 = vsel %vm354_vm2, %v1011_v4, %v1013_v3  ;;  %v1031_v49 = vsel %vm354_vm2, %v1001_v48, %v1011_v4  ;;  %v1099_v12 = vmul.f32 %v2848_v6, %v2616_v28  ;;  %v1101_v60 = vmul.f32 %v2854_v18, %v2636_v47  ;;  %v3469_v4 = vld [vmem:[#allocation13_spill] sm:$0xff] }
 0x400   :  { %v1036_v13 = vmul.f32 %v1031_v49, %v2589_v44  ;;  %v1037_v23 = vmul.f32 %v1019_v9, %v2582_v37  ;;  %1367 = vmatprep.subr.bf16.mxu0 %v991_v10  ;;  %v1098_v47 = vmul.f32 %v2839_v24, %v2619_v32  ;;  %v1131_v6 = vsel %vm470_vm4, %v3029_v40, %v3015_v30  ;;  %v3470_v10 = vld [vmem:[#allocation14_spill] sm:$0xff] }
 0x401   :  { %1368 = vmatpush1.bf16.msra.mxu0 %v990_v35  ;;  %v1109_v28 = vpack.c.bf16 %v1105_v59, %v1101_v60  ;;  %v1130_v18 = vsel %vm470_vm4, %v3032_v45, %v3029_v40  ;;  %v1146_v9 = vsel %vm470_vm4, %v3038_v39, %v3032_v45 }
 0x402   :  { %v1040_v3 = vpack.c.bf16 %v1036_v13, %v1032_v29  ;;  %v1061_v44 = vpop.permute.xlu0 %1060  ;;  %v1065_v48 = vpop.permute.xlu1 %1064  ;;  %v1041_v37 = vpack.c.bf16 %v1037_v23, %v1033_v11  ;;  %v1148_v58 = vmul.f32 %v1130_v18, %v3470_v10  ;;  %v3478_v18 = vld [vmem:[#allocation31_spill] sm:$0xff] }
 0x403   :  { %v1069_v56 = vsel %vm405_vm3, %v1061_v44, %v1063_v61  ;;  %v1081_v42 = vsel %vm405_vm3, %v1051_v20, %v1061_v44  ;;  %v1070_v33 = vsel %vm405_vm3, %v1063_v61, %v1065_v48  ;;  %v1071_v34 = vsel %vm405_vm3, %v1065_v48, %v1051_v20 }
 0x404   :  { %v1086_v36 = vmul.f32 %v1081_v42, %v2625_v38  ;;  %v1087_v16 = vmul.f32 %v1069_v56, %v2612_v26  ;;  %v1088_v7 = vmul.f32 %v1070_v33, %v2643_v50  ;;  %v1089_v31 = vmul.f32 %v1071_v34, %v2646_v1  ;;  %1369 = vmatprep.subr.bf16.mxu0 %v1041_v37  ;;  %v3474_v56 = vld [vmem:[#allocation17_spill] sm:$0xff] }
 0x405   :  { %1370 = vmatpush1.bf16.msra.mxu0 %v1040_v3  ;;  %v1102_v26 = vmul.f32 %v2890_v22, %v2619_v32  ;;  %v1104_v50 = vmul.f32 %v2910_v63, %v2650_v55  ;;  %v1107_v1 = vpack.c.bf16 %v1103_v41, %v1099_v12  ;;  %v3468_v22 = vld [vmem:[#allocation29_spill] sm:$0xff]  ;;  %v1149_v20 = vmul.f32 %v1131_v6, %v3469_v4  ;;  %v3472_v41 = vld [vmem:[#allocation16_spill] sm:$0xff] }
 0x406   :  { %v1090_v5 = vpack.c.bf16 %v1086_v36, %v1082_v27  ;;  %v1092_v61 = vpack.c.bf16 %v1088_v7, %v1084_v17  ;;  %v3134_v62 = vpop.permute.xlu0 %1264  ;;  %v1127_v46 = vpop.permute.xlu1 %1126  ;;  %v1091_v38 = vpack.c.bf16 %v1087_v16, %v1083_v43  ;;  %v1093_v15 = vpack.c.bf16 %v1089_v31, %v1085_v21  ;;  %v3471_v43 = vld [vmem:[#allocation15_spill] sm:$0xff]  ;;  %v3473_v21 = vld [vmem:[#allocation30_spill] sm:$0xff] }
 0x407   :  { %v1100_v63 = vmul.f32 %v3468_v22, %v2650_v55  ;;  %v1106_v24 = vpack.c.bf16 %v1102_v26, %v1098_v47  ;;  %v1132_v55 = vsel %vm470_vm4, %v3015_v30, %v3038_v39  ;;  %v1151_v59 = vmul.f32 %v1146_v9, %v3472_v41  ;;  %v3475_v31 = vld [vmem:[#allocation18_spill] sm:$0xff]  ;;  %v3476_v26 = vld [vmem:[#allocation19_spill] sm:$0xff] }
 0x408   :  { %1371 = vmatprep.subr.bf16.mxu0 %v1091_v38  ;;  %1414 = vmatprep.subr.bf16.mxu1 %v1093_v15  ;;  %v1150_v27 = vmul.f32 %v1132_v55, %v3471_v43  ;;  %v1181_v39 = vsel %vm521_vm5, %v3045_v14, %v3473_v21  ;;  %v1180_v34 = vsel %vm521_vm5, %v3053_v57, %v3045_v14 }
 0x409   :  { %1372 = vmatpush1.bf16.msra.mxu0 %v1090_v5  ;;  %1415 = vmatpush1.bf16.msra.mxu1 %v1092_v61  ;;  %v1108_v35 = vpack.c.bf16 %v1104_v50, %v1100_v63  ;;  %v1199_v42 = vmul.f32 %v1181_v39, %v3474_v56  ;;  %v1198_v12 = vmul.f32 %v1180_v34, %v3475_v31 }
 0x40a   :  { %v1125_v53 = vpop.permute.xlu0 %1124  ;;  %1373 = vmatprep.subr.bf16.mxu0 %v1107_v1  ;;  %1416 = vmatprep.subr.bf16.mxu1 %v1109_v28  ;;  %v1123_v54 = vpop.permute.xlu1 %1122  ;;  %v1182_v5 = vsel %vm521_vm5, %v3473_v21, %v3055_v2  ;;  %v1196_v61 = vsel %vm521_vm5, %v3055_v2, %v3053_v57  ;;  %v3477_v1 = vld [vmem:[#allocation20_spill] sm:$0xff]  ;;  %v1231_v22 = vsel %vm572_vm6, %v3060_v19, %v3478_v18 }
 0x40b   :  { %v1134_v52 = vsel %vm470_vm4, %v1125_v53, %v1127_v46  ;;  %v1133_v32 = vsel %vm470_vm4, %v1123_v54, %v1125_v53  ;;  %v1200_v50 = vmul.f32 %v1182_v5, %v3476_v26  ;;  %v1201_v28 = vmul.f32 %v1196_v61, %v3477_v1 }
 0x40c   :  { %v1153_v40 = vmul.f32 %v1134_v52, %v3469_v4  ;;  %v1152_v51 = vmul.f32 %v1133_v32, %v3470_v10  ;;  %v3479_v52 = vld [vmem:[#allocation21_spill] sm:$0xff]  ;;  %v1232_v55 = vsel %vm572_vm6, %v3478_v18, %v3070_v25  ;;  %v1246_v9 = vsel %vm572_vm6, %v3070_v25, %v3068_v8 }
 0x40d   :  { %1374 = vmatpush1.bf16.msra.mxu0 %v1106_v24  ;;  %1417 = vmatpush1.bf16.msra.mxu1 %v1108_v35  ;;  %v1249_v32 = vmul.f32 %v1231_v22, %v3479_v52  ;;  %v1230_v35 = vsel %vm572_vm6, %v3068_v8, %v3060_v19 }
 0x40e   :  { %v1156_v49 = vpack.c.bf16 %v1152_v51, %v1148_v58  ;;  %v1129_v11 = vpop.permute.xlu1 %1128  ;;  %v1157_v29 = vpack.c.bf16 %v1153_v40, %v1149_v20  ;;  %v1175_v45 = vpop.permute.xlu0 %1174  ;;  %v3480_v58 = vld [vmem:[#allocation22_spill] sm:$0xff] }
 0x40f   :  { %v1135_v13 = vsel %vm470_vm4, %v1127_v46, %v1129_v11  ;;  %v1147_v23 = vsel %vm470_vm4, %v1129_v11, %v1123_v54  ;;  %v1248_v40 = vmul.f32 %v1230_v35, %v3480_v58 }
 0x410   :  { %v1154_v17 = vmul.f32 %v1135_v13, %v3471_v43  ;;  %v1155_v30 = vmul.f32 %v1147_v23, %v3472_v41  ;;  %1375 = vmatprep.subr.bf16.mxu0 %v1157_v29  ;;  %v3481_v13 = vld [vmem:[#allocation23_spill] sm:$0xff]  ;;  %v3482_v43 = vld [vmem:[#allocation24_spill] sm:$0xff] }
 0x411   :  { %1376 = vmatpush1.bf16.msra.mxu0 %v1156_v49  ;;  %v1250_v23 = vmul.f32 %v1232_v55, %v3481_v13 }
 0x412   :  { %v1158_v3 = vpack.c.bf16 %v1154_v17, %v1150_v27  ;;  %v1177_v44 = vpop.permute.xlu1 %1176  ;;  %v1159_v48 = vpack.c.bf16 %v1155_v30, %v1151_v59  ;;  %v1225_v57 = vpop.permute.xlu0 %1224  ;;  %v1251_v27 = vmul.f32 %v1246_v9, %v3482_v43  ;;  %v3483_v30 = vld [vmem:[#allocation32_spill] sm:$0xff] }
 0x413   :  { %v1184_v37 = vsel %vm521_vm5, %v1175_v45, %v1177_v44  ;;  %v1281_v8 = vsel %vm623_vm7, %v3078_v0, %v3483_v30 }
 0x414   :  { %v1203_v33 = vmul.f32 %v1184_v37, %v3474_v56  ;;  %1418 = vmatprep.subr.bf16.mxu1 %v1159_v48  ;;  %v1280_v37 = vsel %vm623_vm7, %v3134_v62, %v3078_v0 }
 0x415   :  { %1419 = vmatpush1.bf16.msra.mxu1 %v1158_v3  ;;  %v3484_v3 = vld [vmem:[#allocation25_spill] sm:$0xff] }
 0x416   :  { %v1173_v36 = vpop.permute.xlu1 %1172  ;;  %v1207_v16 = vpack.c.bf16 %v1203_v33, %v1199_v42  ;;  %v1275_v41 = vpop.permute.xlu0 %1274 }
 0x417   :  { %v1183_v7 = vsel %vm521_vm5, %v1173_v36, %v1175_v45 }
 0x418   :  { %v1202_v60 = vmul.f32 %v1183_v7, %v3475_v31  ;;  %1377 = vmatprep.subr.bf16.mxu0 %v1207_v16 }
 0x41a   :  { %v1206_v46 = vpack.c.bf16 %v1202_v60, %v1198_v12  ;;  %v1179_v14 = vpop.permute.xlu1 %1178  ;;  %v1271_v56 = vpop.permute.xlu0 %1270 }
 0x41b   :  { %v1185_v38 = vsel %vm521_vm5, %v1177_v44, %v1179_v14  ;;  %v1197_v15 = vsel %vm521_vm5, %v1179_v14, %v1173_v36  ;;  %v1299_v44 = vmul.f32 %v3484_v3, %v1281_v8  ;;  %v3485_v36 = vld [vmem:[#allocation26_spill] sm:$0xff]  ;;  %v1282_v31 = vsel %vm623_vm7, %v3483_v30, %v1271_v56  ;;  %v3486_v14 = vld [vmem:[#allocation27_spill] sm:$0xff] }
 0x41c   :  { %v1204_v47 = vmul.f32 %v1185_v38, %v3476_v26  ;;  %v1205_v6 = vmul.f32 %v1197_v15, %v3477_v1  ;;  %1378 = vmatpush1.bf16.msra.mxu0 %v1206_v46  ;;  %v1298_v16 = vmul.f32 %v3485_v36, %v1280_v37  ;;  %v1296_v12 = vsel %vm623_vm7, %v1271_v56, %v3134_v62  ;;  %v2157_v46 = vld [vmem:[#allocation6 + $0x10] ss:$8 sps:$4 sm:$0xff]   ;;  %v3487_v15 = vld [vmem:[#allocation28_spill] sm:$0xff] }
 0x41d   :  { %v1300_v38 = vmul.f32 %v3486_v14, %v1282_v31  ;;  %v1301_v26 = vmul.f32 %v3487_v15, %v1296_v12  ;;  %v1930_v31 = vld [vmem:[%s3408_s3 + $0x18] sm:$0xff] }
 0x41e   :  { %v1208_v2 = vpack.c.bf16 %v1204_v47, %v1200_v50  ;;  %v1227_v63 = vpop.permute.xlu1 %1226  ;;  %v1209_v53 = vpack.c.bf16 %v1205_v6, %v1201_v28 }
 0x41f   :  { %v1234_v54 = vsel %vm572_vm6, %v1225_v57, %v1227_v63 }
 0x420   :  { %v1253_v24 = vmul.f32 %v1234_v54, %v3479_v52  ;;  %1420 = vmatprep.subr.bf16.mxu1 %v1209_v53 }
 0x421   :  { %1421 = vmatpush1.bf16.msra.mxu1 %v1208_v2 }
 0x422   :  { %v1223_v4 = vpop.permute.xlu1 %1222  ;;  %v1257_v20 = vpack.c.bf16 %v1253_v24, %v1249_v32 }
 0x423   :  { %v1233_v10 = vsel %vm572_vm6, %v1223_v4, %v1225_v57 }
 0x424   :  { %v1252_v51 = vmul.f32 %v1233_v10, %v3480_v58  ;;  %1379 = vmatprep.subr.bf16.mxu0 %v1257_v20 }
 0x426   :  { %v1256_v49 = vpack.c.bf16 %v1252_v51, %v1248_v40  ;;  %v1229_v19 = vpop.permute.xlu1 %1228 }
 0x427   :  { %v1235_v11 = vsel %vm572_vm6, %v1227_v63, %v1229_v19  ;;  %v1247_v29 = vsel %vm572_vm6, %v1229_v19, %v1223_v4 }
 0x428   :  { %v1254_v59 = vmul.f32 %v1235_v11, %v3481_v13  ;;  %v1255_v17 = vmul.f32 %v1247_v29, %v3482_v43  ;;  %1380 = vmatpush1.bf16.msra.mxu0 %v1256_v49 }
 0x42a   :  { %v1258_v25 = vpack.c.bf16 %v1254_v59, %v1250_v23  ;;  %v1277_v21 = vpop.permute.xlu1 %1276  ;;  %v1259_v39 = vpack.c.bf16 %v1255_v17, %v1251_v27 }
 0x42b   :  { %v1284_v45 = vsel %vm623_vm7, %v1275_v41, %v1277_v21 }
 0x42c   :  { %v1303_v48 = vmul.f32 %v3484_v3, %v1284_v45  ;;  %1422 = vmatprep.subr.bf16.mxu1 %v1259_v39 }
 0x42d   :  { %1423 = vmatpush1.bf16.msra.mxu1 %v1258_v25 }
 0x42e   :  { %v1273_v42 = vpop.permute.xlu1 %1272  ;;  %v1307_v33 = vpack.c.bf16 %v1303_v48, %v1299_v44 }
 0x42f   :  { %v1283_v34 = vsel %vm623_vm7, %v1273_v42, %v1275_v41 }
 0x430   :  { %v1302_v7 = vmul.f32 %v3485_v36, %v1283_v34  ;;  %1381 = vmatprep.subr.bf16.mxu0 %v1307_v33  ;;  %v1929_v33 = vld [vmem:[%s3408_s3 + $0x10] sm:$0xff]  ;;  %s2276_s3 = smov [#allocation9]  }
 0x432   :  { %v1306_v60 = vpack.c.bf16 %v1302_v7, %v1298_v16  ;;  %v1279_v5 = vpop.permute.xlu1 %1278  ;;  %v1931_v16 = vld [vmem:[%s3409_s4 + $0x10] sm:$0xff] }
 0x433   :  { %v1285_v0 = vsel %vm623_vm7, %v1277_v21, %v1279_v5  ;;  %v1297_v61 = vsel %vm623_vm7, %v1279_v5, %v1273_v42 }
 0x434   :  { %v1304_v50 = vmul.f32 %v3486_v14, %v1285_v0  ;;  %v1305_v1 = vmul.f32 %v3487_v15, %v1297_v61  ;;  %1382 = vmatpush1.bf16.msra.mxu0 %v1306_v60  ;;  %v1932_v0 = vld [vmem:[%s3409_s4 + $0x18] sm:$0xff]  ;;  %v1699_v14 = vld [vmem:[#allocation8 + $0x80] sm:$0xff]  ;;  %s1904_s4 = sshll.u32 %s2276_s3, 4  ;;  %s1905_s4 = int_to_ptr.vmem [resolvable:$true] %s1904_s4 }
 0x435   :  { %v1731_v15 = vld [vmem:[#allocation8 + $0x180] sm:$0xff]  ;;  %p2237_p11 = scmp.lt.s32.totalorder %s1905_s4, %s1905_s4 }
 0x436   :  { %v1308_v28 = vpack.c.bf16 %v1304_v50, %v1300_v38  ;;  %v1309_v47 = vpack.c.bf16 %v1305_v1, %v1301_v26  ;;  %v1700_v38 = vld [vmem:[#allocation8 + $0x88] sm:$0xff]  ;;  %v1683_v1 = vld [vmem:[#allocation8] sm:$0xff] }
 0x437   :  { %1398 = vmatmul.mubr.bf16.vlgmr.msra.gmra.mrb[4].mxu0 %v2157_v46  ;;  %v2009_v26 = vpack.c.bf16 %v1700_v38, %v1699_v14  ;;  %v1732_v50 = vld [vmem:[#allocation8 + $0x188] sm:$0xff]  ;;  %v1723_v38 = vld [vmem:[#allocation8 + $0x140] sm:$0xff] }
 0x438   :  { %1424 = vmatprep.subr.bf16.mxu1 %v1309_v47  ;;  %v2041_v47 = vpack.c.bf16 %v1732_v50, %v1731_v15  ;;  %v1724_v15 = vld [vmem:[#allocation8 + $0x148] sm:$0xff] }
 0x439   :  { %1425 = vmatpush1.bf16.msra.mxu1 %v1308_v28  ;;  %v1684_v28 = vld [vmem:[#allocation8 + $0x8] sm:$0xff]  ;;  %2010 = vmatprep.subr.bf16.mxu0 %v2009_v26  ;;  %v2059_v50 = vpack.c.bf16 %v1724_v15, %v1723_v38 }
 0x43a   :  { %2042 = vmatprep.subr.bf16.mxu1 %v2041_v47  ;;  %v1741_v47 = vld [vmem:[#allocation8 + $0x1d0] sm:$0xff] }
 0x43c   :  { %1441 = vmatmul.mubr.bf16.vlgmr.msra.gmra.mrb[4].mxu1 %v2157_v46 }
 0x50a   :  { %v3238_v62 = vpop.f32.mrb[4].mxu0 }
 0x50b   :  { %v1461_v6 = vmul.f32 %v3238_v62, %v3238_v62  ;;  %v3242_v18 = vpop.f32.mrb[5].mxu0 }
 0x50c   :  { %v1451_v22 = vadd.f32 %v3242_v18, %v3238_v62  ;;  %v1462_v57 = vmul.f32 %v3242_v18, %v3242_v18  ;;  %v3248_v2 = vpop.f32.mrb[6].mxu0 }
 0x50d   :  { %v1465_v63 = vmul.f32 %v3248_v2, %v3248_v2  ;;  %v3252_v53 = vpop.f32.mrb[7].mxu0 }
 0x50e   :  { %v1469_v54 = vadd.f32 %v1462_v57, %v1461_v6  ;;  %v1456_v52 = vadd.f32 %v3252_v53, %v3248_v2  ;;  %v1466_v32 = vmul.f32 %v3252_v53, %v3252_v53  ;;  %v2011_v6 = vpack.c.bf16 %v1684_v28, %v1683_v1  ;;  %v1716_v57 = vld [vmem:[#allocation8 + $0x108] sm:$0xff]  ;;  %v1709_v1 = vld [vmem:[#allocation8 + $0xd0] sm:$0xff]  ;;  %v1710_v28 = vld [vmem:[#allocation8 + $0xd8] sm:$0xff] }
 0x50f   :  { %v3258_v24 = vpop.f32.mrb[4].mxu1 }
 0x510   :  { %v1474_v35 = vadd.f32 %v1466_v32, %v1465_v63  ;;  %v1452_v4 = vadd.f32 %v1451_v22, %v3258_v24  ;;  %v1463_v20 = vmul.f32 %v3258_v24, %v3258_v24  ;;  %v3263_v10 = vpop.f32.mrb[5].mxu1  ;;  %v1715_v22 = vld [vmem:[#allocation8 + $0x100] sm:$0xff]  ;;  %v1701_v63 = vld [vmem:[#allocation8 + $0x90] sm:$0xff]  ;;  %2012 = vmatpush3.bf16.msra.mxu0 %v2011_v6 }
 0x511   :  { %v1464_v58 = vmul.f32 %v3263_v10, %v3263_v10  ;;  %v3267_v40 = vpop.f32.mrb[6].mxu1  ;;  %v1733_v32 = vld [vmem:[#allocation8 + $0x190] sm:$0xff] }
 0x512   :  { %v1470_v51 = vadd.f32 %v1469_v54, %v1463_v20  ;;  %v1453_v55 = vadd.f32 %v1452_v4, %v3263_v10  ;;  %v1457_v9 = vadd.f32 %v1456_v52, %v3267_v40  ;;  %v1467_v49 = vmul.f32 %v3267_v40, %v3267_v40  ;;  %v3273_v19 = vpop.f32.mrb[7].mxu1  ;;  %v1702_v52 = vld [vmem:[#allocation8 + $0x98] sm:$0xff] }
 0x513   :  { %v1468_v11 = vmul.f32 %v3273_v19, %v3273_v19  ;;  %v2043_v54 = vpack.c.bf16 %v1716_v57, %v1715_v22  ;;  %v2013_v4 = vpack.c.bf16 %v1702_v52, %v1701_v63  ;;  %v2029_v57 = vpack.c.bf16 %v1710_v28, %v1709_v1  ;;  %v1742_v63 = vld [vmem:[#allocation8 + $0x1d8] sm:$0xff] }
 0x514   :  { %v1475_v29 = vadd.f32 %v1474_v35, %v1467_v49  ;;  %v1458_v13 = vadd.f32 %v1457_v9, %v3273_v19  ;;  %1454 = vadd.xlane.f32.xlu0 %v1453_v55  ;;  %v1471_v23 = vadd.f32 %v1470_v51, %v1464_v58  ;;  %v1734_v35 = vld [vmem:[#allocation8 + $0x198] sm:$0xff]  ;;  %v1685_v58 = vld [vmem:[#allocation8 + $0x10] sm:$0xff] }
 0x515   :  { %v2045_v20 = vpack.c.bf16 %v1734_v35, %v1733_v32  ;;  %v1686_v51 = vld [vmem:[#allocation8 + $0x18] sm:$0xff]  ;;  %v1717_v55 = vld [vmem:[#allocation8 + $0x110] sm:$0xff]  ;;  %2044 = vmatpush3.bf16.msra.mxu1 %v2043_v54  ;;  %2014 = vmatprep.subr.bf16.mxu0 %v2013_v4  ;;  %v2061_v4 = vpack.c.bf16 %v1742_v63, %v1741_v47 }
 0x516   :  { %1472 = vadd.xlane.f32.xlu1 %v1471_v23  ;;  %v1476_v43 = vadd.f32 %v1475_v29, %v1468_v11  ;;  %v2015_v9 = vpack.c.bf16 %v1686_v51, %v1685_v58  ;;  %v1718_v49 = vld [vmem:[#allocation8 + $0x118] sm:$0xff]  ;;  %v1703_v11 = vld [vmem:[#allocation8 + $0xa0] sm:$0xff]  ;;  %v1704_v29 = vld [vmem:[#allocation8 + $0xa8] sm:$0xff] }
 0x517   :  { %2046 = vmatprep.subr.bf16.mxu1 %v2045_v20  ;;  %v2017_v23 = vpack.c.bf16 %v1704_v29, %v1703_v11  ;;  %v1693_v54 = vld [vmem:[#allocation8 + $0x50] sm:$0xff]  ;;  %v1694_v52 = vld [vmem:[#allocation8 + $0x58] sm:$0xff]  ;;  %v1711_v29 = vld [vmem:[#allocation8 + $0xe0] sm:$0xff] }
 0x518   :  { %1459 = vadd.xlane.f32.xlu0 %v1458_v13  ;;  %v2047_v13 = vpack.c.bf16 %v1718_v49, %v1717_v55  ;;  %2016 = vmatpush3.bf16.msra.mxu0 %v2015_v9  ;;  %v2031_v20 = vpack.c.bf16 %v1694_v52, %v1693_v54  ;;  %v1725_v58 = vld [vmem:[#allocation8 + $0x150] sm:$0xff]  ;;  %v1726_v51 = vld [vmem:[#allocation8 + $0x158] sm:$0xff] }
 0x519   :  { %2018 = vmatprep.subr.bf16.mxu0 %v2017_v23  ;;  %v2063_v9 = vpack.c.bf16 %v1726_v51, %v1725_v58  ;;  %v1743_v23 = vld [vmem:[#allocation8 + $0x1e0] sm:$0xff] }
 0x51a   :  { %2048 = vmatpush3.bf16.msra.mxu1 %v2047_v13 }
 0x51c   :  { %1477 = vadd.xlane.f32.xlu0 %v1476_v43  ;;  %v1735_v43 = vld [vmem:[#allocation8 + $0x1a0] sm:$0xff] }
 0x5a1   :  { %v1455_v27 = vpop.xlane.xlu0 %1454 }
 0x5a2   :  { %v1479_v41 = vmul.f32 0.001953125, %v1455_v27  ;;  %v1736_v27 = vld [vmem:[#allocation8 + $0x1a8] sm:$0xff] }
 0x5a3   :  { %v1473_v59 = vpop.xlane.xlu1 %1472 }
 0x5a4   :  { %v1483_v17 = vmul.f32 %v1479_v41, %v1479_v41  ;;  %v1481_v30 = vmul.f32 0.001953125, %v1473_v59  ;;  %v2049_v59 = vpack.c.bf16 %v1736_v27, %v1735_v43  ;;  %v1744_v43 = vld [vmem:[#allocation8 + $0x1e8] sm:$0xff] }
 0x5a5   :  { %v1460_v8 = vpop.xlane.xlu0 %1459 }
 0x5a6   :  { %v1485_v25 = vsub.f32 %v1481_v30, %v1483_v17  ;;  %v1480_v21 = vmul.f32 0.001953125, %v1460_v8  ;;  %v1688_v17 = vld [vmem:[#allocation8 + $0x28] sm:$0xff]  ;;  %v1719_v30 = vld [vmem:[#allocation8 + $0x120] sm:$0xff]  ;;  %2050 = vmatprep.subr.bf16.mxu1 %v2049_v59 }
 0x5a7   :  { %v1720_v8 = vld [vmem:[#allocation8 + $0x128] sm:$0xff] }
 0x5a8   :  { %v1487_v39 = vmax.f32 %v1485_v25, 0.0  ;;  %v1484_v44 = vmul.f32 %v1480_v21, %v1480_v21 }
 0x5a9   :  { %v1478_v45 = vpop.xlane.xlu0 %1477 }
 0x5aa   :  { %v1489_v3 = vadd.f32 1e-05, %v1487_v39  ;;  %v1482_v48 = vmul.f32 0.001953125, %v1478_v45  ;;  %v1706_v39 = vld [vmem:[#allocation8 + $0xb8] sm:$0xff]  ;;  %v1737_v45 = vld [vmem:[#allocation8 + $0x1b0] sm:$0xff] }
 0x5ac   :  { %2162 = vrsqrt.f32 %v1489_v3  ;;  %v1486_v37 = vsub.f32 %v1482_v48, %v1484_v44  ;;  %v2051_v3 = vpack.c.bf16 %v1720_v8, %v1719_v30  ;;  %v1738_v48 = vld [vmem:[#allocation8 + $0x1b8] sm:$0xff]  ;;  %v1695_v30 = vld [vmem:[#allocation8 + $0x60] sm:$0xff]  ;;  %v1696_v8 = vld [vmem:[#allocation8 + $0x68] sm:$0xff] }
 0x5ae   :  { %v1488_v56 = vmax.f32 %v1486_v37, 0.0  ;;  %v1689_v37 = vld [vmem:[#allocation8 + $0x30] sm:$0xff]  ;;  %2052 = vmatpush3.bf16.msra.mxu1 %v2051_v3 }
 0x5af   :  { %v1713_v3 = vld [vmem:[#allocation8 + $0xf0] sm:$0xff] }
 0x5b0   :  { %v1490_v42 = vadd.f32 1e-05, %v1488_v56  ;;  %v1690_v56 = vld [vmem:[#allocation8 + $0x38] sm:$0xff] }
 0x5b2   :  { %2164 = vrsqrt.f32 %v1490_v42  ;;  %v2053_v42 = vpack.c.bf16 %v1738_v48, %v1737_v45  ;;  %v1745_v48 = vld [vmem:[#allocation8 + $0x1f0] sm:$0xff] }
 0x5b4   :  { %2054 = vmatprep.subr.bf16.mxu1 %v2053_v42  ;;  %v2065_v42 = vpack.c.bf16 %v1744_v43, %v1743_v23 }
 0x5b6   :  { %v2163_v34 = vpop.eup %2162 }
 0x5b7   :  { %v1496_v36 = vmul.f32 %v2163_v34, %v1929_v33  ;;  %v1721_v33 = vld [vmem:[#allocation8 + $0x130] sm:$0xff]  ;;  %v1722_v34 = vld [vmem:[#allocation8 + $0x138] sm:$0xff] }
 0x5b9   :  { %1507 = vperm.xlu1 %2090, %v1496_v36   ;;  %v1501_v7 = vmul.f32 %v1496_v36, %v1479_v41  ;;  %v1687_v41 = vld [vmem:[#allocation8 + $0x20] sm:$0xff]  ;;  %v2023_v36 = vpack.c.bf16 %v1690_v56, %v1689_v37 }
 0x5ba   :  { %v2019_v25 = vpack.c.bf16 %v1688_v17, %v1687_v41 }
 0x5bb   :  { %v1503_v12 = vsub.f32 %v1931_v16, %v1501_v7  ;;  %v2055_v16 = vpack.c.bf16 %v1722_v34, %v1721_v33  ;;  %v1707_v7 = vld [vmem:[#allocation8 + $0xc0] sm:$0xff]  ;;  %v2035_v33 = vpack.c.bf16 %v1696_v8, %v1695_v30  ;;  %v1746_v34 = vld [vmem:[#allocation8 + $0x1f8] sm:$0xff] }
 0x5bc   :  { %v2165_v60 = vpop.eup %2164  ;;  %2020 = vmatpush3.bf16.msra.mxu0 %v2019_v25  ;;  %v1727_v25 = vld [vmem:[#allocation8 + $0x160] sm:$0xff] }
 0x5bd   :  { %1525 = vperm.xlu0 %2091, %v1503_v12   ;;  %v1497_v5 = vmul.f32 %v2165_v60, %v1930_v31  ;;  %2056 = vmatpush3.bf16.msra.mxu1 %v2055_v16  ;;  %v1708_v31 = vld [vmem:[#allocation8 + $0xc8] sm:$0xff]  ;;  %v1739_v12 = vld [vmem:[#allocation8 + $0x1c0] sm:$0xff] }
 0x5be   :  { %v2025_v60 = vpack.c.bf16 %v1708_v31, %v1707_v7 }
 0x5bf   :  { %1512 = vperm.xlu1 %2090, %v1497_v5   ;;  %v1502_v61 = vmul.f32 %v1497_v5, %v1480_v21  ;;  %v1705_v21 = vld [vmem:[#allocation8 + $0xb0] sm:$0xff]  ;;  %v1740_v5 = vld [vmem:[#allocation8 + $0x1c8] sm:$0xff] }
 0x5c0   :  { %v2021_v44 = vpack.c.bf16 %v1706_v39, %v1705_v21  ;;  %v1728_v21 = vld [vmem:[#allocation8 + $0x168] sm:$0xff] }
 0x5c1   :  { %v1504_v46 = vsub.f32 %v1932_v0, %v1502_v61  ;;  %v1691_v0 = vld [vmem:[#allocation8 + $0x40] sm:$0xff]  ;;  %v1692_v61 = vld [vmem:[#allocation8 + $0x48] sm:$0xff] }
 0x5c2   :  { %2022 = vmatprep.subr.bf16.mxu0 %v2021_v44  ;;  %v2027_v14 = vpack.c.bf16 %v1692_v61, %v1691_v0  ;;  %v1714_v44 = vld [vmem:[#allocation8 + $0xf8] sm:$0xff]  ;;  %v2069_v61 = vpack.c.bf16 %v1746_v34, %v1745_v48 }
 0x5c3   :  { %1530 = vperm.xlu1 %2090, %v1504_v46   ;;  %2024 = vmatpush3.bf16.msra.mxu0 %v2023_v36  ;;  %v2057_v46 = vpack.c.bf16 %v1740_v5, %v1739_v12  ;;  %v1697_v36 = vld [vmem:[#allocation8 + $0x70] sm:$0xff]  ;;  %v1698_v12 = vld [vmem:[#allocation8 + $0x78] sm:$0xff]  ;;  %v2037_v0 = vpack.c.bf16 %v1714_v44, %v1713_v3 }
 0x5c4   :  { %2026 = vmatprep.subr.bf16.mxu0 %v2025_v60  ;;  %v1729_v60 = vld [vmem:[#allocation8 + $0x170] sm:$0xff]  ;;  %v1730_v5 = vld [vmem:[#allocation8 + $0x178] sm:$0xff] }
 0x5c5   :  { %2058 = vmatprep.subr.bf16.mxu1 %v2057_v46  ;;  %v2071_v38 = vpack.c.bf16 %v1730_v5, %v1729_v60 }
 0x5c6   :  { %2060 = vmatpush3.bf16.msra.mxu1 %v2059_v50 }
 0x5c7   :  { %2028 = vmatpush3.bf16.msra.mxu0 %v2027_v14  ;;  %2062 = vmatprep.subr.bf16.mxu1 %v2061_v4 }
 0x5c8   :  { %2030 = vmatprep.subr.bf16.mxu0 %v2029_v57 }
 0x5ca   :  { %2064 = vmatpush3.bf16.msra.mxu1 %v2063_v9 }
 0x5cb   :  { %2032 = vmatpush3.bf16.msra.mxu0 %v2031_v20  ;;  %2066 = vmatprep.subr.bf16.mxu1 %v2065_v42 }
 0x638   :  { %v1508_v26 = vpop.permute.xlu1 %1507 }
 0x639   :  { %v1515_v6 = vmul.f32 %v1508_v26, %v3238_v62  ;;  %v1516_v22 = vmul.f32 %v1508_v26, %v3242_v18  ;;  %v1517_v32 = vmul.f32 %v1508_v26, %v3258_v24  ;;  %v1518_v35 = vmul.f32 %v1508_v26, %v3263_v10  ;;  %v1712_v24 = vld [vmem:[#allocation8 + $0xe8] sm:$0xff] }
 0x63a   :  { %v2033_v10 = vpack.c.bf16 %v1712_v24, %v1711_v29 }
 0x63c   :  { %v1526_v55 = vpop.permute.xlu0 %1525  ;;  %2034 = vmatprep.subr.bf16.mxu0 %v2033_v10 }
 0x63d   :  { %v3294_v62 = vadd.f32 %v1526_v55, %v1515_v6  ;;  %v3296_v18 = vadd.f32 %v1526_v55, %v1516_v22  ;;  %v3298_v49 = vadd.f32 %v1526_v55, %v1517_v32  ;;  %v3300_v11 = vadd.f32 %v1526_v55, %v1518_v35  ;;  %2036 = vmatpush3.bf16.msra.mxu0 %v2035_v33 }
 0x63e   :  { %v1513_v13 = vpop.permute.xlu1 %1512  ;;  %2038 = vmatprep.subr.bf16.mxu0 %v2037_v0 }
 0x63f   :  { %v1541_v27 = vmax.f32 %v3294_v62, 0.0  ;;  %v1542_v41 = vmax.f32 %v3296_v18, 0.0  ;;  %v1543_v59 = vmax.f32 %v3298_v49, 0.0  ;;  %v1544_v17 = vmax.f32 %v3300_v11, 0.0 }
 0x640   :  { %v1519_v37 = vmul.f32 %v1513_v13, %v3248_v2  ;;  %v1520_v16 = vmul.f32 %v1513_v13, %v3252_v53  ;;  %v1521_v7 = vmul.f32 %v1513_v13, %v3267_v40  ;;  %v1522_v31 = vmul.f32 %v1513_v13, %v3273_v19 }
 0x641   :  { %v2097_v39 = vpack.i.bf16 %v1544_v17, %v1543_v59  ;;  %v2092_v45 = vpack.i.bf16 %v1542_v41, %v1541_v27  ;;  %v2067_v2 = vpack.c.bf16 %v1728_v21, %v1727_v25  ;;  %v2039_v19 = vpack.c.bf16 %v1698_v12, %v1697_v36 }
 0x642   :  { %v1531_v56 = vpop.permute.xlu1 %1530 }
 0x643   :  { %2098 = vrot.lane.b32.xlu1 %v2097_v39, %s2271_s16  ;;  %2093 = vrot.lane.b32.xlu0 %v2092_v45, %s2271_s16  ;;  %v3320_v46 = vadd.f32 %v1531_v56, %v1519_v37  ;;  %v3322_v14 = vadd.f32 %v1531_v56, %v1521_v7  ;;  %v3324_v53 = vadd.f32 %v1531_v56, %v1522_v31 }
 0x644   :  { %v3326_v40 = vadd.f32 %v1531_v56, %v1520_v16  ;;  %2068 = vmatpush3.bf16.msra.mxu1 %v2067_v2  ;;  %2040 = vmatpush3.bf16.msra.mxu0 %v2039_v19 }
 0x645   :  { %2070 = vmatprep.subr.bf16.mxu1 %v2069_v61  ;;  %v1547_v15 = vmax.f32 %v3322_v14, 0.0  ;;  %v1548_v26 = vmax.f32 %v3324_v53, 0.0  ;;  %v1545_v50 = vmax.f32 %v3320_v46, 0.0 }
 0x646   :  { %v1546_v1 = vmax.f32 %v3326_v40, 0.0 }
 0x647   :  { %2108 = vrot.lane.b32.xlu1 %v2097_v39, %s2273_s18  ;;  %2103 = vrot.lane.b32.xlu0 %v2092_v45, %s2273_s18  ;;  %v2127_v28 = vpack.i.bf16 %v1548_v26, %v1547_v15 }
 0x648   :  { %2072 = vmatpush3.bf16.msra.mxu1 %v2071_v38  ;;  %v2122_v47 = vpack.i.bf16 %v1546_v1, %v1545_v50 }
 0x64b   :  { %2118 = vrot.lane.b32.xlu1 %v2097_v39, %s2274_s19  ;;  %2113 = vrot.lane.b32.xlu0 %v2092_v45, %s2274_s19 }
 0x64f   :  { %2128 = vrot.lane.b32.xlu1 %v2127_v28, %s2271_s16  ;;  %2123 = vrot.lane.b32.xlu0 %v2122_v47, %s2271_s16  ;;  %s2232_s16 = scalar_lea.vmem %s1905_s4, 256 }
 0x650   :  { %p2233_p10 = scmp.ne.s32.totalorder %s1905_s4, %s2232_s16  ;;  %p2238_p12 = scmp.lt.s32.totalorder %s2232_s16, %s2232_s16 }
 0x652   :  { %p2239_p13 = por %p2238_p12, %p2237_p11 }
 0x653   :  { %2138 = vrot.lane.b32.xlu1 %v2127_v28, %s2273_s18  ;;  %2133 = vrot.lane.b32.xlu0 %v2122_v47, %s2273_s18 }
 0x654   :  { %p2240_p0 = pnand %p2239_p13, %p2233_p10 }
 0x657   :  { %2148 = vrot.lane.b32.xlu1 %v2127_v28, %s2274_s19  ;;  %2143 = vrot.lane.b32.xlu0 %v2122_v47, %s2274_s19 }
 0x6b5   :  { %v2099_v6 = vpop.permute.xlu1 %2098  ;;  %v2094_v22 = vpop.permute.xlu0 %2093 }
 0x6b6   :  { %v2101_v57 = vunpack.i.h.bf16 %v2099_v6  ;;  %v2100_v63 = vunpack.i.l.bf16 %v2099_v6  ;;  %v2096_v54 = vunpack.i.h.bf16 %v2094_v22  ;;  %v2095_v52 = vunpack.i.l.bf16 %v2094_v22 }
 0x6b8   :  { %v1575_v4 = vsel %vm470_vm4, %v2100_v63, %v2101_v57  ;;  %v1574_v20 = vsel %vm470_vm4, %v2096_v54, %v2100_v63  ;;  %v1573_v58 = vsel %vm470_vm4, %v2095_v52, %v2096_v54  ;;  %v1589_v51 = vsel %vm470_vm4, %v2101_v57, %v2095_v52 }
 0x6b9   :  { %v2109_v32 = vpop.permute.xlu1 %2108  ;;  %v2104_v35 = vpop.permute.xlu0 %2103  ;;  %v1661_v10 = vmax.f32 %v1543_v59, %v1575_v4  ;;  %v1659_v23 = vmax.f32 %v1541_v27, %v1573_v58  ;;  %v1660_v39 = vmax.f32 %v1542_v41, %v1574_v20  ;;  %v1662_v45 = vmax.f32 %v1544_v17, %v1589_v51 }
 0x6ba   :  { %v2111_v55 = vunpack.i.h.bf16 %v2109_v32  ;;  %v2110_v9 = vunpack.i.l.bf16 %v2109_v32  ;;  %v2106_v29 = vunpack.i.h.bf16 %v2104_v35  ;;  %v2105_v24 = vunpack.i.l.bf16 %v2104_v35 }
 0x6bc   :  { %v1609_v3 = vsel %vm572_vm6, %v2110_v9, %v2111_v55  ;;  %v1608_v44 = vsel %vm572_vm6, %v2106_v29, %v2110_v9  ;;  %v1607_v49 = vsel %vm572_vm6, %v2105_v24, %v2106_v29  ;;  %v1623_v41 = vsel %vm572_vm6, %v2111_v55, %v2105_v24 }
 0x6bd   :  { %v2119_v13 = vpop.permute.xlu1 %2118  ;;  %v2114_v8 = vpop.permute.xlu0 %2113 }
 0x6be   :  { %v2121_v43 = vunpack.i.h.bf16 %v2119_v13  ;;  %v2120_v30 = vunpack.i.l.bf16 %v2119_v13  ;;  %v2116_v25 = vunpack.i.h.bf16 %v2114_v8  ;;  %v2115_v21 = vunpack.i.l.bf16 %v2114_v8 }
 0x6c0   :  { %v1643_v62 = vsel %vm623_vm7, %v2120_v30, %v2121_v43  ;;  %v1642_v59 = vsel %vm623_vm7, %v2116_v25, %v2120_v30  ;;  %v1641_v48 = vsel %vm623_vm7, %v2115_v21, %v2116_v25  ;;  %v1657_v37 = vsel %vm623_vm7, %v2121_v43, %v2115_v21 }
 0x6c1   :  { %v1669_v27 = vmax.f32 %v1609_v3, %v1643_v62  ;;  %v2129_v18 = vpop.permute.xlu1 %2128  ;;  %v1667_v11 = vmax.f32 %v1607_v49, %v1641_v48  ;;  %v2124_v56 = vpop.permute.xlu0 %2123  ;;  %v1668_v42 = vmax.f32 %v1608_v44, %v1642_v59  ;;  %v1670_v16 = vmax.f32 %v1623_v41, %v1657_v37 }
 0x6c2   :  { %v2131_v17 = vunpack.i.h.bf16 %v2129_v18  ;;  %v2130_v33 = vunpack.i.l.bf16 %v2129_v18  ;;  %v2126_v34 = vunpack.i.h.bf16 %v2124_v56  ;;  %v2125_v36 = vunpack.i.l.bf16 %v2124_v56 }
 0x6c3   :  { %v1676_v7 = vmax.f32 %v1660_v39, %v1668_v42  ;;  %v1675_v31 = vmax.f32 %v1659_v23, %v1667_v11  ;;  %v1677_v12 = vmax.f32 %v1661_v10, %v1669_v27  ;;  %v1678_v5 = vmax.f32 %v1662_v45, %v1670_v16 }
 0x6c4   :  { %v1577_v0 = vsel %vm470_vm4, %v2126_v34, %v2130_v33  ;;  %v1590_v61 = vsel %vm470_vm4, %v2131_v17, %v2125_v36  ;;  %v1578_v28 = vsel %vm470_vm4, %v2130_v33, %v2131_v17  ;;  %v1576_v22 = vsel %vm470_vm4, %v2125_v36, %v2126_v34 }
 0x6c5   :  { %v2139_v60 = vpop.permute.xlu1 %2138  ;;  %v2134_v2 = vpop.permute.xlu0 %2133  ;;  %1811 = vmatprep.mubr.f32.mxu0 %v1676_v7  ;;  %1886 = vmatprep.mubr.f32.mxu1 %v1678_v5  ;;  %v1664_v32 = vmax.f32 %v1546_v1, %v1577_v0  ;;  %v1666_v35 = vmax.f32 %v1548_v26, %v1590_v61  ;;  %v1665_v51 = vmax.f32 %v1547_v15, %v1578_v28 }
 0x6c6   :  { %v2141_v19 = vunpack.i.h.bf16 %v2139_v60  ;;  %v2140_v38 = vunpack.i.l.bf16 %v2139_v60  ;;  %1812 = vmatmul.mubr.f32.vlgmr.msra.gmra.mrb[8].mxu0 %v1675_v31  ;;  %v2136_v47 = vunpack.i.h.bf16 %v2134_v2  ;;  %v2135_v6 = vunpack.i.l.bf16 %v2134_v2  ;;  %1887 = vmatmul.mubr.f32.vlgmr.msra.gmra.mrb[8].mxu1 %v1677_v12 }
 0x6c7   :  { %v1663_v14 = vmax.f32 %v1545_v50, %v1576_v22 }
 0x6c8   :  { %v1612_v4 = vsel %vm572_vm6, %v2140_v38, %v2141_v19  ;;  %v1611_v55 = vsel %vm572_vm6, %v2136_v47, %v2140_v38  ;;  %v1610_v9 = vsel %vm572_vm6, %v2135_v6, %v2136_v47  ;;  %v1624_v29 = vsel %vm572_vm6, %v2141_v19, %v2135_v6 }
 0x6c9   :  { %v2149_v57 = vpop.permute.xlu1 %2148  ;;  %v2144_v52 = vpop.permute.xlu0 %2143 }
 0x6ca   :  { %v2151_v63 = vunpack.i.h.bf16 %v2149_v57  ;;  %v2150_v54 = vunpack.i.l.bf16 %v2149_v57  ;;  %v2146_v20 = vunpack.i.h.bf16 %v2144_v52  ;;  %v2145_v58 = vunpack.i.l.bf16 %v2144_v52 }
 0x6cc   :  { %v1646_v24 = vsel %vm623_vm7, %v2150_v54, %v2151_v63  ;;  %v1645_v40 = vsel %vm623_vm7, %v2146_v20, %v2150_v54  ;;  %v1644_v53 = vsel %vm623_vm7, %v2145_v58, %v2146_v20  ;;  %v1658_v26 = vsel %vm623_vm7, %v2151_v63, %v2145_v58 }
 0x6cd   :  { %v1673_v1 = vmax.f32 %v1612_v4, %v1646_v24  ;;  %v1672_v13 = vmax.f32 %v1611_v55, %v1645_v40  ;;  %v1674_v10 = vmax.f32 %v1624_v29, %v1658_v26  ;;  %v1671_v15 = vmax.f32 %v1610_v9, %v1644_v53 }
 0x6cf   :  { %v1681_v23 = vmax.f32 %v1665_v51, %v1673_v1  ;;  %v1680_v43 = vmax.f32 %v1664_v32, %v1672_v13  ;;  %v1682_v30 = vmax.f32 %v1666_v35, %v1674_v10  ;;  %v1679_v8 = vmax.f32 %v1663_v14, %v1671_v15 }
 0x6d1   :  { %1816 = vmatprep.mubr.f32.mxu0 %v1680_v43  ;;  %1891 = vmatprep.mubr.f32.mxu1 %v1682_v30 }
 0x6d2   :  { %1817 = vmatmul.mubr.f32.gmra.mrb[10].mxu0 %v1679_v8  ;;  %1892 = vmatmul.mubr.f32.gmra.mrb[10].mxu1 %v1681_v23 }
 0x799   :  { %v1965_v25 = vpop.f32.mrb[8].mxu0  ;;  %v2003_v21 = vpop.f32.mrb[8].mxu1 }
 0x79a   :  { %v1966_v39 = vpop.f32.mrb[9].mxu0  ;;  %v2004_v3 = vpop.f32.mrb[9].mxu1 }
 0x79b   :  { %v1967_v45 = vadd.f32 %v1966_v39, %v1965_v25  ;;  %v2005_v44 = vadd.f32 %v2004_v3, %v2003_v21 }
 0x79d   :  { %v1889_v49 = vadd.f32 %v2005_v44, %v1967_v45 }
 0x79f   :  { %1897 = vst [vmem:[#allocation9] sm:$0xff] %v1889_v49 }
 0x7a5   :  { %v1968_v62 = vpop.f32.mrb[10].mxu0  ;;  %v2006_v46 = vpop.f32.mrb[10].mxu1 }
 0x7a6   :  { %v1969_v50 = vpop.f32.mrb[11].mxu0  ;;  %v2007_v27 = vpop.f32.mrb[11].mxu1 }
 0x7a7   :  { %v1970_v59 = vadd.f32 %v1969_v50, %v1968_v62  ;;  %v2008_v48 = vadd.f32 %v2007_v27, %v2006_v46 }
 0x7a9   :  { %v1894_v37 = vadd.f32 %v2008_v48, %v1970_v59 }
 0x7ab   :  { %1898 = vst [vmem:[#allocation9 + $0x8] sm:$0xff] %v1894_v37 }
 0x7ac   :  { %2243 = shalt.err (!%p2240_p0)
}
 0x7ad   :  { %s2244_s28 = scalar_lea.hbm %s3411_s6, 256 }
 0x7ae   :  { %p2245_p1 = scmp.ne.s32.totalorder %s3411_s6, %s2244_s28  ;;  %p2248_p2 = scmp.lt.u32.totalorder %s2244_s28, %s3411_s6 }
 0x7b0   :  { %p2250_p3 = pnand %p2248_p2, %p2245_p1 }
 0x7b2   :  { %2253 = shalt.err (!%p2250_p3)
}
 0x7b3   :  { %1910 = dma.vmem_to_hbm [thread:$0]  %s1905_s4, 256, %s3411_s6, [#allocation5], %s2261_s7, %s2261_s7, %s2262_s8  }
 0x7b4   :  { %2258 = dma.done.wait [#allocation5], 256  }
 0x7b5   :  { %2259 = vsyncadd [#allocation5], 4294967040 }
 0x7b6   :  { %1914 = vsyncpa [#allocation4], 1 }
 0x7b7   :  { %1915 = vsyncpa [#allocation7], 1 }
 0x7b8   :  { %1916 = vsyncpa [#allocation5], 1 }

</bundles_post_ra>
